<compile_context>
chip_gen: v7x
topology: tpu7x:2x2x1
jax: 0.10.0
libtpu: 0.0.40
codegen_flags: <defaults>
</compile_context>

<pallas_src>
import jax
import jax.numpy as jnp
import numpy as np
from jax import lax
from jax.experimental import pallas as pl
from jax.experimental.pallas import tpu as pltpu

NEG_SLOPE = 0.01  # nn.LeakyReLU default negative slope


def _round_up(x, m):
    return ((x + m - 1) // m) * m


def _cdiv(a, b):
    return -(-a // b)


# ------------------------- Fused GRU + attention kernel ----------------------
def gru_attn_kernel(x_ref, wih_ref, whh_ref, bih_ref, bhh_ref,
                    w1_ref, b1_ref, w2_ref, b2_ref, wa_ref, ba_ref,
                    att_ref, ma_ref,
                    gi_scr, y_scr):
    # x_ref:   (S, Bt, E)  bf16 time-major embeddings for this batch tile
    # wih_ref: (E, 3*Hp)   whh_ref: (Hp, 3*Hp)   [bf16, gate-padded]
    # bih/bhh: (1, 3*Hp) f32
    # w1: (Hp, Hp) bf16  b1: (1, Hp) f32   w2: (Hp, Kp) bf16  b2: (1, Kp) f32
    # wa: (1, Kp) f32    ba: (1, 1) f32 in SMEM
    # att_ref: (Bt, Hp) f32    ma_ref: (S, Bt, Kp) bf16
    # gi_scr: (S, Bt, 3*Hp) bf16   y_scr: (S, Bt, Hp) f32   (VMEM scratch)
    S, Bt, E = x_ref.shape
    Hp = y_scr.shape[-1]
    Kp = ma_ref.shape[-1]

    # ---- hoisted input projection: one large bf16 MXU matmul, f32 accumulate ----
    x_all = x_ref[...].reshape(S * Bt, E)
    gi_all = jnp.dot(x_all, wih_ref[...], preferred_element_type=jnp.float32)
    gi_all = gi_all + bih_ref[...]
    gi_scr[...] = gi_all.reshape(S, Bt, 3 * Hp).astype(gi_scr.dtype)

    whh = whh_ref[...]          # bf16
    bhh = bhh_ref[...]          # f32

    # ---- serial GRU recurrence: only h @ W_hh is on the critical path ----
    def step(t, h):                                   # h: (Bt, Hp) f32
        gi = gi_scr[t].astype(jnp.float32)            # (Bt, 3Hp)
        gh = jnp.dot(h.astype(whh.dtype), whh,
                     preferred_element_type=jnp.float32) + bhh
        r = jax.nn.sigmoid(gi[:, 0:Hp] + gh[:, 0:Hp])
        z = jax.nn.sigmoid(gi[:, Hp:2 * Hp] + gh[:, Hp:2 * Hp])
        n = jnp.tanh(gi[:, 2 * Hp:3 * Hp] + r * gh[:, 2 * Hp:3 * Hp])
        h_new = (1.0 - z) * n + z * h
        y_scr[t] = h_new                              # stays in VMEM (f32)
        return h_new

    h0 = jnp.zeros((Bt, Hp), dtype=jnp.float32)
    lax.fori_loop(0, S, step, h0, unroll=True)

    # ---- attention, batched over all S*Bt rows (fills MXU rows) ----
    y3 = y_scr[...]                                   # (S, Bt, Hp) f32
    yf = y3.reshape(S * Bt, Hp)
    h1 = jnp.dot(yf.astype(w1_ref.dtype), w1_ref[...],
                 preferred_element_type=jnp.float32) + b1_ref[...]
    h1 = jnp.where(h1 >= 0, h1, NEG_SLOPE * h1)       # LeakyReLU
    ma = jnp.dot(h1.astype(w2_ref.dtype), w2_ref[...],
                 preferred_element_type=jnp.float32) + b2_ref[...]
    ma3 = ma.reshape(S, Bt, Kp)
    ma_ref[...] = ma3.astype(ma_ref.dtype)            # lane-dense bf16 store

    # pooled embedding:  out[b] = sum_s <ma[s,b,:], wa> * y[s,b,:] + ba
    w_sb = jnp.sum(ma3 * wa_ref[...][None, :, :], axis=-1, keepdims=True)  # (S,Bt,1)
    att = jnp.sum(y3 * w_sb, axis=0) + ba_ref[0, 0]   # (Bt, Hp) f32
    att_ref[...] = att.astype(att_ref.dtype)


# -------------------- One-time weight transpose / padding --------------------
def prepare_kernel_params(p, lane=128, compute_dtype=jnp.bfloat16):
    """Transpose + zero-pad weights once (NOT per forward call).
    MXU operands go to `compute_dtype` (bf16); biases / pooling weights stay f32."""
    H = p["gru_whh"].shape[1]
    K = p["ws2_w"].shape[0]
    Hp = _round_up(H, lane)
    Kp = _round_up(K, lane)

    def pad_gate_cols(w):      # (rows, 3H) -> (rows, 3Hp); each gate padded to Hp
        gates = jnp.split(w, 3, axis=1)
        gates = [jnp.pad(g, ((0, 0), (0, Hp - H))) for g in gates]
        return jnp.concatenate(gates, axis=1)

    def pad_gate_bias(b):      # (3H,) -> (1, 3Hp)
        gates = jnp.split(b, 3)
        gates = [jnp.pad(g, (0, Hp - H)) for g in gates]
        return jnp.concatenate(gates)[None, :]

    wih = pad_gate_cols(p["gru_wih"].T)                                  # (E, 3Hp)
    whh = jnp.pad(pad_gate_cols(p["gru_whh"].T), ((0, Hp - H), (0, 0)))  # (Hp, 3Hp)

    return dict(
        embedding=p["embedding"],
        wih=wih.astype(compute_dtype), whh=whh.astype(compute_dtype),
        bih=pad_gate_bias(p["gru_bih"]), bhh=pad_gate_bias(p["gru_bhh"]),     # f32
        w1=jnp.pad(p["ws1_w"].T, ((0, Hp - H), (0, Hp - H))).astype(compute_dtype),
        b1=jnp.pad(p["ws1_b"], (0, Hp - H))[None, :],                         # f32
        w2=jnp.pad(p["ws2_w"].T, ((0, Hp - H), (0, Kp - K))).astype(compute_dtype),
        b2=jnp.pad(p["ws2_b"], (0, Kp - K))[None, :],                         # f32
        wa=jnp.pad(p["ingre2att_w"], ((0, 0), (0, Kp - K))),                  # f32, VPU only
        ba=p["ingre2att_b"].reshape(1, 1),                                    # f32 -> SMEM
        H=H, K=K, Hp=Hp, Kp=Kp, compute_dtype=compute_dtype,
    )


# ------------------------ Generation-aware tile selection --------------------
def _device_tuning():
    """Chip-generation aware knobs: MXU rows, min grid steps, physical VMEM."""
    try:
        kind = jax.devices()[0].device_kind.lower()
    except Exception:
        kind = ""
    newer = any(t in kind for t in ("v6", "v7", "7x"))
    bt_mxu = 256 if newer else 128            # 256-row MXU on v6e/v7x, 128 on v5e-
    two_tc = ("v7" in kind) or ("7x" in kind)
    min_tiles = 2 if two_tc else 1            # keep both v7x TensorCores busy
    try:
        vmem_phys = int(pltpu.get_tpu_info().vmem_capacity_bytes)
    except Exception:
        vmem_phys = (64 if two_tc else 128) * 1024 * 1024
    return bt_mxu, min_tiles, vmem_phys


def _tile_vmem_bytes(bt, S, E, Hp, Kp, in_bytes, acc_bytes=4):
    """Per-grid-step VMEM estimate (double-buffered I/O blocks + scratch + weights)."""
    x_b = 2 * S * bt * E * in_bytes                 # x block (2 buffers, bf16)
    gi_b = S * bt * 3 * Hp * in_bytes               # gi_scr (bf16)
    y_b = S * bt * Hp * acc_bytes                   # y_scr (f32)
    ma_b = 2 * S * bt * Kp * in_bytes               # ma out block (2 buffers, bf16)
    att_b = 2 * bt * Hp * acc_bytes                 # att out block
    w_b = (2 * ((E + Hp) * 3 * Hp + Hp * Hp + Hp * Kp) * in_bytes
           + 2 * (2 * 3 * Hp + Hp + 2 * Kp) * acc_bytes)
    return x_b + gi_b + y_b + ma_b + att_b + w_b


def _select_batch_tile(B, S, E, Hp, Kp, bt_mxu, min_tiles, vmem_budget, in_bytes):
    bt_cap = max(8, (bt_mxu // 8) * 8)
    while bt_cap > 8 and _tile_vmem_bytes(bt_cap, S, E, Hp, Kp, in_bytes) > vmem_budget:
        bt_cap -= 8
    n_tiles = max(_cdiv(B, bt_cap), 1)
    if B >= min_tiles * 8:               # only split if every tile keeps >=8 real rows
        n_tiles = max(n_tiles, min_tiles)
    bt = _round_up(_cdiv(B, n_tiles), 8)  # balanced split -> minimal Bp padding
    return bt, n_tiles * bt


# ---------------------------------- Wrapper ----------------------------------
def gru_encoder_t_forward(y_idx, kp, batch_block=None):
    B, S = y_idx.shape
    E = kp["embedding"].shape[1]
    H, K, Hp, Kp = kp["H"], kp["K"], kp["Hp"], kp["Kp"]
    cdt = kp["compute_dtype"]
    in_bytes = jnp.dtype(cdt).itemsize

    # embedding gather + time-major permute (glue; encoder_t_embeds is an output)
    # TODO(synk): fold this gather into the kernel via scalar-prefetched y_idx once
    # E is large enough (e.g. GloVe E=300) for the extra HBM passes to matter.
    emb = jnp.take(kp["embedding"], y_idx, axis=0)          # (B, S, E) f32
    encoder_t_embeds = jnp.transpose(emb, (1, 0, 2))        # (S, B, E) f32

    # generation-aware batch tile + VMEM budget
    bt_mxu, min_tiles, vmem_phys = _device_tuning()
    vmem_limit = max(32 * 1024 * 1024,
                     min(vmem_phys * 3 // 4, 96 * 1024 * 1024))
    if batch_block is not None:
        bt = _round_up(batch_block, 8)
        Bp = _round_up(B, bt)
    else:
        bt, Bp = _select_batch_tile(B, S, E, Hp, Kp, bt_mxu, min_tiles,
                                    int(vmem_limit * 0.9), in_bytes)

    x = encoder_t_embeds.astype(cdt)                        # bf16 MXU operand
    if Bp != B:
        x = jnp.pad(x, ((0, 0), (0, Bp - B), (0, 0)))

    grid_spec = pltpu.PrefetchScalarGridSpec(
        num_scalar_prefetch=0,
        grid=(Bp // bt,),
        in_specs=[
            pl.BlockSpec((S, bt, E), lambda i: (0, i, 0)),         # x (time-major, bf16)
            # grid-invariant weights (index maps constant); could be single-buffered
            # via pipeline_mode=pl.Buffered(1) — left double-buffered (tiny) for safety.
            pl.BlockSpec((E, 3 * Hp), lambda i: (0, 0)),           # W_ih^T (bf16)
            pl.BlockSpec((Hp, 3 * Hp), lambda i: (0, 0)),          # W_hh^T (bf16)
            pl.BlockSpec((1, 3 * Hp), lambda i: (0, 0)),           # b_ih (f32)
            pl.BlockSpec((1, 3 * Hp), lambda i: (0, 0)),           # b_hh (f32)
            pl.BlockSpec((Hp, Hp), lambda i: (0, 0)),              # ws1^T (bf16)
            pl.BlockSpec((1, Hp), lambda i: (0, 0)),               # ws1 bias (f32)
            pl.BlockSpec((Hp, Kp), lambda i: (0, 0)),              # ws2^T (bf16)
            pl.BlockSpec((1, Kp), lambda i: (0, 0)),               # ws2 bias (f32)
            pl.BlockSpec((1, Kp), lambda i: (0, 0)),               # ingre2att weight (f32)
            pl.BlockSpec(memory_space=pltpu.MemorySpace.SMEM),     # ingre2att bias (scalar)
        ],
        out_specs=[
            pl.BlockSpec((bt, Hp), lambda i: (i, 0)),              # pooled embedding (f32)
            pl.BlockSpec((S, bt, Kp), lambda i: (0, i, 0)),        # multi-attention (bf16)
        ],
        scratch_shapes=[
            pltpu.VMEM((S, bt, 3 * Hp), cdt),                      # hoisted input gates (bf16)
            pltpu.VMEM((S, bt, Hp), jnp.float32),                  # GRU outputs (never hit HBM)
        ],
    )

    att_pad, ma_pad = pl.pallas_call(
        gru_attn_kernel,
        grid_spec=grid_spec,
        out_shape=(
            jax.ShapeDtypeStruct((Bp, Hp), jnp.float32),
            jax.ShapeDtypeStruct((S, Bp, Kp), cdt),
        ),
        compiler_params=pltpu.CompilerParams(
            dimension_semantics=("parallel",),
            vmem_limit_bytes=int(vmem_limit),
        ),
    )(x, kp["wih"], kp["whh"], kp["bih"], kp["bhh"],
      kp["w1"], kp["b1"], kp["w2"], kp["b2"], kp["wa"], kp["ba"])

    att_y_embeds = att_pad[:B, :H]                                 # (B, H) f32
    # slice BEFORE transposing: only (S, B, K) useful bytes go through the HBM
    # permute instead of the full padded (S, Bp, 128) array.
    multi_attention = jnp.transpose(
        ma_pad[:, :B, :K].astype(jnp.float32), (1, 0, 2))          # (B, S, K)
    return att_y_embeds, encoder_t_embeds, multi_attention


# ------------------------- Deterministic params ------------------------------
def init_params(key, vocab_glove, E, H, K):
    ks = jax.random.split(key, 11)

    def nrm(k, shape, s):
        return (jax.random.normal(k, shape, jnp.float32) * s).astype(jnp.float32)

    glove = nrm(ks[0], (vocab_glove, E), 0.1)       # synthetic "gloveVector"
    emb = jnp.concatenate([jnp.zeros((1, E), jnp.float32), glove], axis=0)
    return dict(
        embedding=emb,
        gru_wih=nrm(ks[1], (3 * H, E), 0.05),
        gru_whh=nrm(ks[2], (3 * H, H), 0.05),
        gru_bih=nrm(ks[3], (3 * H,), 0.05),
        gru_bhh=nrm(ks[4], (3 * H,), 0.05),
        ws1_w=nrm(ks[5], (H, H), 0.01),             # nn.init.normal_(w, 0, 0.01)
        ws1_b=nrm(ks[6], (H,), 0.05),
        ws2_w=nrm(ks[7], (K, H), 0.01),
        ws2_b=nrm(ks[8], (K,), 0.05),
        ingre2att_w=nrm(ks[9], (1, K), 0.01),
        ingre2att_b=nrm(ks[10], (1,), 0.05),
    )


# --------------------------- Pure-JAX reference ------------------------------
def reference_forward(y_idx, p):
    emb = jnp.take(p["embedding"], y_idx, axis=0)
    x = jnp.transpose(emb, (1, 0, 2))
    H = p["gru_whh"].shape[1]
    B = y_idx.shape[0]

    def step(h, x_t):
        gi = x_t @ p["gru_wih"].T + p["gru_bih"]
        gh = h @ p["gru_whh"].T + p["gru_bhh"]
        r = jax.nn.sigmoid(gi[:, :H] + gh[:, :H])
        z = jax.nn.sigmoid(gi[:, H:2 * H] + gh[:, H:2 * H])
        n = jnp.tanh(gi[:, 2 * H:] + r * gh[:, 2 * H:])
        h_new = (1.0 - z) * n + z * h
        return h_new, h_new

    h0 = jnp.zeros((B, H), jnp.float32)
    _, ys = lax.scan(step, h0, x)                   # (S, B, H)
    yb = jnp.transpose(ys, (1, 0, 2))               # (B, S, H)
    h1 = yb @ p["ws1_w"].T + p["ws1_b"]
    h1 = jnp.where(h1 >= 0, h1, NEG_SLOPE * h1)
    ma = h1 @ p["ws2_w"].T + p["ws2_b"]             # (B, S, K)
    att_bkh = jnp.einsum("bsk,bsh->bkh", ma, yb)
    out = jnp.einsum("bkh,k->bh", att_bkh, p["ingre2att_w"][0]) + p["ingre2att_b"][0]
    return out, x, ma


if __name__ == "__main__":
    B, S, E, H, K = 2, 8, 16, 32, 5
    V_GLOVE = 19                                    # vocab = V_GLOVE + 1 (pad)

    key = jax.random.PRNGKey(0)
    kparam, ky = jax.random.split(key)
    params = init_params(kparam, V_GLOVE, E, H, K)
    prepped = prepare_kernel_params(params)          # one-time transpose/pad/bf16-cast
    y_idx = jax.random.randint(ky, (B, S), 0, V_GLOVE + 1, dtype=jnp.int32)

    att, enc_embeds, multi_att = gru_encoder_t_forward(y_idx, prepped)
    jax.block_until_ready((att, enc_embeds, multi_att))

    ref_att, ref_enc, ref_ma = reference_forward(y_idx, params)
    assert att.shape == (B, H)
    assert enc_embeds.shape == (S, B, E)
    assert multi_att.shape == (B, S, K)
    # enc_embeds is pure f32 gather/permute -> exact; bf16 MXU path -> loosened tolerances
    np.testing.assert_allclose(np.asarray(enc_embeds), np.asarray(ref_enc),
                               rtol=1e-5, atol=1e-6)
    np.testing.assert_allclose(np.asarray(multi_att), np.asarray(ref_ma),
                               rtol=5e-2, atol=5e-3)
    np.testing.assert_allclose(np.asarray(att), np.asarray(ref_att),
                               rtol=5e-2, atol=5e-3)
    print("KERNEL_OK")
</pallas_src>

<mosaic_0001>
module attributes {stable_mosaic.version = 11 : i64} {
  func.func @gru_attn_kernel(%arg0: i32, %arg1: memref<8x8x16xbf16, #tpu.memory_space<vmem>>, %arg2: memref<16x384xbf16, #tpu.memory_space<vmem>>, %arg3: memref<128x384xbf16, #tpu.memory_space<vmem>>, %arg4: memref<1x384xf32, #tpu.memory_space<vmem>>, %arg5: memref<1x384xf32, #tpu.memory_space<vmem>>, %arg6: memref<128x128xbf16, #tpu.memory_space<vmem>>, %arg7: memref<1x128xf32, #tpu.memory_space<vmem>>, %arg8: memref<128x128xbf16, #tpu.memory_space<vmem>>, %arg9: memref<1x128xf32, #tpu.memory_space<vmem>>, %arg10: memref<1x128xf32, #tpu.memory_space<vmem>>, %arg11: memref<1x1xf32, #tpu.memory_space<smem>>, %arg12: memref<8x128xf32, #tpu.memory_space<vmem>>, %arg13: memref<8x8x128xbf16, #tpu.memory_space<vmem>>, %arg14: memref<8x8x384xbf16, #tpu.memory_space<vmem>>, %arg15: memref<8x8x128xf32, #tpu.memory_space<vmem>>) attributes {dimension_semantics = [#tpu.dimension_semantics<parallel>], iteration_bounds = array<i64: 1>, scalar_prefetch = 0 : i64, scratch_operands = 2 : i64, tpu.core_type = #tpu.core_type<tc>, window_params = [{transform_indices = @transform_0, window_bounds = array<i64: 8, 8, 16>}, {pipeline_mode = #tpu.pipeline_mode<synchronous>, transform_indices = @transform_1, window_bounds = array<i64: 16, 384>}, {pipeline_mode = #tpu.pipeline_mode<synchronous>, transform_indices = @transform_2, window_bounds = array<i64: 128, 384>}, {pipeline_mode = #tpu.pipeline_mode<synchronous>, transform_indices = @transform_3, window_bounds = array<i64: 1, 384>}, {pipeline_mode = #tpu.pipeline_mode<synchronous>, transform_indices = @transform_4, window_bounds = array<i64: 1, 384>}, {pipeline_mode = #tpu.pipeline_mode<synchronous>, transform_indices = @transform_5, window_bounds = array<i64: 128, 128>}, {pipeline_mode = #tpu.pipeline_mode<synchronous>, transform_indices = @transform_6, window_bounds = array<i64: 1, 128>}, {pipeline_mode = #tpu.pipeline_mode<synchronous>, transform_indices = @transform_7, window_bounds = array<i64: 128, 128>}, {pipeline_mode = #tpu.pipeline_mode<synchronous>, transform_indices = @transform_8, window_bounds = array<i64: 1, 128>}, {pipeline_mode = #tpu.pipeline_mode<synchronous>, transform_indices = @transform_9, window_bounds = array<i64: 1, 128>}, {transform_indices = @transform_10, window_bounds = array<i64: 1, 1>}, {transform_indices = @transform_11, window_bounds = array<i64: 8, 128>}, {transform_indices = @transform_12, window_bounds = array<i64: 8, 8, 128>}]} {
    %c0 = arith.constant 0 : index
    %c0_0 = arith.constant 0 : index
    %c0_1 = arith.constant 0 : index
    %0 = vector.load %arg1[%c0, %c0_0, %c0_1] : memref<8x8x16xbf16, #tpu.memory_space<vmem>>, vector<8x8x16xbf16>
    %1 = vector.shape_cast %0 : vector<8x8x16xbf16> to vector<64x16xbf16>
    %c0_2 = arith.constant 0 : index
    %c0_3 = arith.constant 0 : index
    %2 = vector.load %arg2[%c0_2, %c0_3] : memref<16x384xbf16, #tpu.memory_space<vmem>>, vector<16x384xbf16>
    %cst = arith.constant dense<0.000000e+00> : vector<64x384xf32>
    %3 = tpu.matmul %1, %2, %cst {dimension_numbers = #tpu.dot_dimension_numbers<[1], [0], [0], [1], [0, 0, 1, 1], [], []>} : vector<64x16xbf16>, vector<16x384xbf16>, vector<64x384xf32> -> vector<64x384xf32>
    %c0_4 = arith.constant 0 : index
    %c0_5 = arith.constant 0 : index
    %4 = vector.load %arg4[%c0_4, %c0_5] : memref<1x384xf32, #tpu.memory_space<vmem>>, vector<1x384xf32>
    %5 = vector.broadcast %4 : vector<1x384xf32> to vector<64x384xf32>
    %6 = arith.addf %3, %5 : vector<64x384xf32>
    %7 = vector.shape_cast %6 : vector<64x384xf32> to vector<8x8x384xf32>
    %8 = arith.truncf %7 : vector<8x8x384xf32> to vector<8x8x384xbf16>
    %c0_6 = arith.constant 0 : index
    %c0_7 = arith.constant 0 : index
    %c0_8 = arith.constant 0 : index
    %9 = vector.load %arg14[%c0_6, %c0_7, %c0_8] : memref<8x8x384xbf16, #tpu.memory_space<vmem>>, vector<8x8x384xbf16>
    tpu.vector_store %arg14[%c0_6, %c0_7, %c0_8], %8 {strides = array<i32>} : memref<8x8x384xbf16, #tpu.memory_space<vmem>>, vector<8x8x384xbf16>,
    %c0_9 = arith.constant 0 : index
    %c0_10 = arith.constant 0 : index
    %10 = vector.load %arg3[%c0_9, %c0_10] : memref<128x384xbf16, #tpu.memory_space<vmem>>, vector<128x384xbf16>
    %c0_11 = arith.constant 0 : index
    %c0_12 = arith.constant 0 : index
    %11 = vector.load %arg5[%c0_11, %c0_12] : memref<1x384xf32, #tpu.memory_space<vmem>>, vector<1x384xf32>
    %cst_13 = arith.constant 0.000000e+00 : f32
    %12 = vector.broadcast %cst_13 : f32 to vector<8x128xf32>
    %c0_i32 = arith.constant 0 : i32
    %13 = arith.index_cast %c0_i32 : i32 to index
    %c0_14 = arith.constant 0 : index
    %c0_15 = arith.constant 0 : index
    %14 = vector.load %arg14[%13, %c0_14, %c0_15] : memref<8x8x384xbf16, #tpu.memory_space<vmem>>, vector<1x8x384xbf16>
    %15 = vector.shape_cast %14 : vector<1x8x384xbf16> to vector<8x384xbf16>
    %16 = arith.extf %15 : vector<8x384xbf16> to vector<8x384xf32>
    %17 = arith.truncf %12 : vector<8x128xf32> to vector<8x128xbf16>
    %cst_16 = arith.constant dense<0.000000e+00> : vector<8x384xf32>
    %18 = tpu.matmul %17, %10, %cst_16 {dimension_numbers = #tpu.dot_dimension_numbers<[1], [0], [0], [1], [0, 0, 1, 1], [], []>} : vector<8x128xbf16>, vector<128x384xbf16>, vector<8x384xf32> -> vector<8x384xf32>
    %19 = vector.broadcast %11 : vector<1x384xf32> to vector<8x384xf32>
    %20 = arith.addf %18, %19 : vector<8x384xf32>
    %21 = vector.extract_strided_slice %16 {offsets = [0, 0], sizes = [8, 128], strides = [1, 1]} : vector<8x384xf32> to vector<8x128xf32>
    %22 = vector.extract_strided_slice %20 {offsets = [0, 0], sizes = [8, 128], strides = [1, 1]} : vector<8x384xf32> to vector<8x128xf32>
    %23 = arith.addf %21, %22 : vector<8x128xf32>
    %24 = arith.negf %23 : vector<8x128xf32>
    %25 = math.exp %24 : vector<8x128xf32>
    %cst_17 = arith.constant 1.000000e+00 : f32
    %26 = vector.broadcast %cst_17 : f32 to vector<8x128xf32>
    %27 = arith.addf %26, %25 : vector<8x128xf32>
    %28 = arith.divf %26, %27 : vector<8x128xf32>
    %29 = vector.extract_strided_slice %16 {offsets = [0, 128], sizes = [8, 128], strides = [1, 1]} : vector<8x384xf32> to vector<8x128xf32>
    %30 = vector.extract_strided_slice %20 {offsets = [0, 128], sizes = [8, 128], strides = [1, 1]} : vector<8x384xf32> to vector<8x128xf32>
    %31 = arith.addf %29, %30 : vector<8x128xf32>
    %32 = arith.negf %31 : vector<8x128xf32>
    %33 = math.exp %32 : vector<8x128xf32>
    %cst_18 = arith.constant 1.000000e+00 : f32
    %34 = vector.broadcast %cst_18 : f32 to vector<8x128xf32>
    %35 = arith.addf %34, %33 : vector<8x128xf32>
    %36 = arith.divf %34, %35 : vector<8x128xf32>
    %37 = vector.extract_strided_slice %16 {offsets = [0, 256], sizes = [8, 128], strides = [1, 1]} : vector<8x384xf32> to vector<8x128xf32>
    %38 = vector.extract_strided_slice %20 {offsets = [0, 256], sizes = [8, 128], strides = [1, 1]} : vector<8x384xf32> to vector<8x128xf32>
    %39 = arith.mulf %28, %38 : vector<8x128xf32>
    %40 = arith.addf %37, %39 : vector<8x128xf32>
    %41 = math.tanh %40 : vector<8x128xf32>
    %cst_19 = arith.constant 1.000000e+00 : f32
    %42 = vector.broadcast %cst_19 : f32 to vector<8x128xf32>
    %43 = arith.subf %42, %36 : vector<8x128xf32>
    %44 = arith.mulf %43, %41 : vector<8x128xf32>
    %45 = arith.mulf %36, %12 : vector<8x128xf32>
    %46 = arith.addf %44, %45 : vector<8x128xf32>
    %47 = arith.index_cast %c0_i32 : i32 to index
    %c0_20 = arith.constant 0 : index
    %c0_21 = arith.constant 0 : index
    %48 = vector.load %arg15[%47, %c0_20, %c0_21] : memref<8x8x128xf32, #tpu.memory_space<vmem>>, vector<1x8x128xf32>
    %49 = vector.shape_cast %48 : vector<1x8x128xf32> to vector<8x128xf32>
    %50 = vector.shape_cast %46 : vector<8x128xf32> to vector<1x8x128xf32>
    tpu.vector_store %arg15[%47, %c0_20, %c0_21], %50 {strides = array<i32>} : memref<8x8x128xf32, #tpu.memory_space<vmem>>, vector<1x8x128xf32>,
    %c1_i32 = arith.constant 1 : i32
    %51 = arith.index_cast %c1_i32 : i32 to index
    %c0_22 = arith.constant 0 : index
    %c0_23 = arith.constant 0 : index
    %52 = vector.load %arg14[%51, %c0_22, %c0_23] : memref<8x8x384xbf16, #tpu.memory_space<vmem>>, vector<1x8x384xbf16>
    %53 = vector.shape_cast %52 : vector<1x8x384xbf16> to vector<8x384xbf16>
    %54 = arith.extf %53 : vector<8x384xbf16> to vector<8x384xf32>
    %55 = arith.truncf %46 : vector<8x128xf32> to vector<8x128xbf16>
    %cst_24 = arith.constant dense<0.000000e+00> : vector<8x384xf32>
    %56 = tpu.matmul %55, %10, %cst_24 {dimension_numbers = #tpu.dot_dimension_numbers<[1], [0], [0], [1], [0, 0, 1, 1], [], []>} : vector<8x128xbf16>, vector<128x384xbf16>, vector<8x384xf32> -> vector<8x384xf32>
    %57 = vector.broadcast %11 : vector<1x384xf32> to vector<8x384xf32>
    %58 = arith.addf %56, %57 : vector<8x384xf32>
    %59 = vector.extract_strided_slice %54 {offsets = [0, 0], sizes = [8, 128], strides = [1, 1]} : vector<8x384xf32> to vector<8x128xf32>
    %60 = vector.extract_strided_slice %58 {offsets = [0, 0], sizes = [8, 128], strides = [1, 1]} : vector<8x384xf32> to vector<8x128xf32>
    %61 = arith.addf %59, %60 : vector<8x128xf32>
    %62 = arith.negf %61 : vector<8x128xf32>
    %63 = math.exp %62 : vector<8x128xf32>
    %cst_25 = arith.constant 1.000000e+00 : f32
    %64 = vector.broadcast %cst_25 : f32 to vector<8x128xf32>
    %65 = arith.addf %64, %63 : vector<8x128xf32>
    %66 = arith.divf %64, %65 : vector<8x128xf32>
    %67 = vector.extract_strided_slice %54 {offsets = [0, 128], sizes = [8, 128], strides = [1, 1]} : vector<8x384xf32> to vector<8x128xf32>
    %68 = vector.extract_strided_slice %58 {offsets = [0, 128], sizes = [8, 128], strides = [1, 1]} : vector<8x384xf32> to vector<8x128xf32>
    %69 = arith.addf %67, %68 : vector<8x128xf32>
    %70 = arith.negf %69 : vector<8x128xf32>
    %71 = math.exp %70 : vector<8x128xf32>
    %cst_26 = arith.constant 1.000000e+00 : f32
    %72 = vector.broadcast %cst_26 : f32 to vector<8x128xf32>
    %73 = arith.addf %72, %71 : vector<8x128xf32>
    %74 = arith.divf %72, %73 : vector<8x128xf32>
    %75 = vector.extract_strided_slice %54 {offsets = [0, 256], sizes = [8, 128], strides = [1, 1]} : vector<8x384xf32> to vector<8x128xf32>
    %76 = vector.extract_strided_slice %58 {offsets = [0, 256], sizes = [8, 128], strides = [1, 1]} : vector<8x384xf32> to vector<8x128xf32>
    %77 = arith.mulf %66, %76 : vector<8x128xf32>
    %78 = arith.addf %75, %77 : vector<8x128xf32>
    %79 = math.tanh %78 : vector<8x128xf32>
    %cst_27 = arith.constant 1.000000e+00 : f32
    %80 = vector.broadcast %cst_27 : f32 to vector<8x128xf32>
    %81 = arith.subf %80, %74 : vector<8x128xf32>
    %82 = arith.mulf %81, %79 : vector<8x128xf32>
    %83 = arith.mulf %74, %46 : vector<8x128xf32>
    %84 = arith.addf %82, %83 : vector<8x128xf32>
    %85 = arith.index_cast %c1_i32 : i32 to index
    %c0_28 = arith.constant 0 : index
    %c0_29 = arith.constant 0 : index
    %86 = vector.load %arg15[%85, %c0_28, %c0_29] : memref<8x8x128xf32, #tpu.memory_space<vmem>>, vector<1x8x128xf32>
    %87 = vector.shape_cast %86 : vector<1x8x128xf32> to vector<8x128xf32>
    %88 = vector.shape_cast %84 : vector<8x128xf32> to vector<1x8x128xf32>
    tpu.vector_store %arg15[%85, %c0_28, %c0_29], %88 {strides = array<i32>} : memref<8x8x128xf32, #tpu.memory_space<vmem>>, vector<1x8x128xf32>,
    %c2_i32 = arith.constant 2 : i32
    %89 = arith.index_cast %c2_i32 : i32 to index
    %c0_30 = arith.constant 0 : index
    %c0_31 = arith.constant 0 : index
    %90 = vector.load %arg14[%89, %c0_30, %c0_31] : memref<8x8x384xbf16, #tpu.memory_space<vmem>>, vector<1x8x384xbf16>
    %91 = vector.shape_cast %90 : vector<1x8x384xbf16> to vector<8x384xbf16>
    %92 = arith.extf %91 : vector<8x384xbf16> to vector<8x384xf32>
    %93 = arith.truncf %84 : vector<8x128xf32> to vector<8x128xbf16>
    %cst_32 = arith.constant dense<0.000000e+00> : vector<8x384xf32>
    %94 = tpu.matmul %93, %10, %cst_32 {dimension_numbers = #tpu.dot_dimension_numbers<[1], [0], [0], [1], [0, 0, 1, 1], [], []>} : vector<8x128xbf16>, vector<128x384xbf16>, vector<8x384xf32> -> vector<8x384xf32>
    %95 = vector.broadcast %11 : vector<1x384xf32> to vector<8x384xf32>
    %96 = arith.addf %94, %95 : vector<8x384xf32>
    %97 = vector.extract_strided_slice %92 {offsets = [0, 0], sizes = [8, 128], strides = [1, 1]} : vector<8x384xf32> to vector<8x128xf32>
    %98 = vector.extract_strided_slice %96 {offsets = [0, 0], sizes = [8, 128], strides = [1, 1]} : vector<8x384xf32> to vector<8x128xf32>
    %99 = arith.addf %97, %98 : vector<8x128xf32>
    %100 = arith.negf %99 : vector<8x128xf32>
    %101 = math.exp %100 : vector<8x128xf32>
    %cst_33 = arith.constant 1.000000e+00 : f32
    %102 = vector.broadcast %cst_33 : f32 to vector<8x128xf32>
    %103 = arith.addf %102, %101 : vector<8x128xf32>
    %104 = arith.divf %102, %103 : vector<8x128xf32>
    %105 = vector.extract_strided_slice %92 {offsets = [0, 128], sizes = [8, 128], strides = [1, 1]} : vector<8x384xf32> to vector<8x128xf32>
    %106 = vector.extract_strided_slice %96 {offsets = [0, 128], sizes = [8, 128], strides = [1, 1]} : vector<8x384xf32> to vector<8x128xf32>
    %107 = arith.addf %105, %106 : vector<8x128xf32>
    %108 = arith.negf %107 : vector<8x128xf32>
    %109 = math.exp %108 : vector<8x128xf32>
    %cst_34 = arith.constant 1.000000e+00 : f32
    %110 = vector.broadcast %cst_34 : f32 to vector<8x128xf32>
    %111 = arith.addf %110, %109 : vector<8x128xf32>
    %112 = arith.divf %110, %111 : vector<8x128xf32>
    %113 = vector.extract_strided_slice %92 {offsets = [0, 256], sizes = [8, 128], strides = [1, 1]} : vector<8x384xf32> to vector<8x128xf32>
    %114 = vector.extract_strided_slice %96 {offsets = [0, 256], sizes = [8, 128], strides = [1, 1]} : vector<8x384xf32> to vector<8x128xf32>
    %115 = arith.mulf %104, %114 : vector<8x128xf32>
    %116 = arith.addf %113, %115 : vector<8x128xf32>
    %117 = math.tanh %116 : vector<8x128xf32>
    %cst_35 = arith.constant 1.000000e+00 : f32
    %118 = vector.broadcast %cst_35 : f32 to vector<8x128xf32>
    %119 = arith.subf %118, %112 : vector<8x128xf32>
    %120 = arith.mulf %119, %117 : vector<8x128xf32>
    %121 = arith.mulf %112, %84 : vector<8x128xf32>
    %122 = arith.addf %120, %121 : vector<8x128xf32>
    %123 = arith.index_cast %c2_i32 : i32 to index
    %c0_36 = arith.constant 0 : index
    %c0_37 = arith.constant 0 : index
    %124 = vector.load %arg15[%123, %c0_36, %c0_37] : memref<8x8x128xf32, #tpu.memory_space<vmem>>, vector<1x8x128xf32>
    %125 = vector.shape_cast %124 : vector<1x8x128xf32> to vector<8x128xf32>
    %126 = vector.shape_cast %122 : vector<8x128xf32> to vector<1x8x128xf32>
    tpu.vector_store %arg15[%123, %c0_36, %c0_37], %126 {strides = array<i32>} : memref<8x8x128xf32, #tpu.memory_space<vmem>>, vector<1x8x128xf32>,
    %c3_i32 = arith.constant 3 : i32
    %127 = arith.index_cast %c3_i32 : i32 to index
    %c0_38 = arith.constant 0 : index
    %c0_39 = arith.constant 0 : index
    %128 = vector.load %arg14[%127, %c0_38, %c0_39] : memref<8x8x384xbf16, #tpu.memory_space<vmem>>, vector<1x8x384xbf16>
    %129 = vector.shape_cast %128 : vector<1x8x384xbf16> to vector<8x384xbf16>
    %130 = arith.extf %129 : vector<8x384xbf16> to vector<8x384xf32>
    %131 = arith.truncf %122 : vector<8x128xf32> to vector<8x128xbf16>
    %cst_40 = arith.constant dense<0.000000e+00> : vector<8x384xf32>
    %132 = tpu.matmul %131, %10, %cst_40 {dimension_numbers = #tpu.dot_dimension_numbers<[1], [0], [0], [1], [0, 0, 1, 1], [], []>} : vector<8x128xbf16>, vector<128x384xbf16>, vector<8x384xf32> -> vector<8x384xf32>
    %133 = vector.broadcast %11 : vector<1x384xf32> to vector<8x384xf32>
    %134 = arith.addf %132, %133 : vector<8x384xf32>
    %135 = vector.extract_strided_slice %130 {offsets = [0, 0], sizes = [8, 128], strides = [1, 1]} : vector<8x384xf32> to vector<8x128xf32>
    %136 = vector.extract_strided_slice %134 {offsets = [0, 0], sizes = [8, 128], strides = [1, 1]} : vector<8x384xf32> to vector<8x128xf32>
    %137 = arith.addf %135, %136 : vector<8x128xf32>
    %138 = arith.negf %137 : vector<8x128xf32>
    %139 = math.exp %138 : vector<8x128xf32>
    %cst_41 = arith.constant 1.000000e+00 : f32
    %140 = vector.broadcast %cst_41 : f32 to vector<8x128xf32>
    %141 = arith.addf %140, %139 : vector<8x128xf32>
    %142 = arith.divf %140, %141 : vector<8x128xf32>
    %143 = vector.extract_strided_slice %130 {offsets = [0, 128], sizes = [8, 128], strides = [1, 1]} : vector<8x384xf32> to vector<8x128xf32>
    %144 = vector.extract_strided_slice %134 {offsets = [0, 128], sizes = [8, 128], strides = [1, 1]} : vector<8x384xf32> to vector<8x128xf32>
    %145 = arith.addf %143, %144 : vector<8x128xf32>
    %146 = arith.negf %145 : vector<8x128xf32>
    %147 = math.exp %146 : vector<8x128xf32>
    %cst_42 = arith.constant 1.000000e+00 : f32
    %148 = vector.broadcast %cst_42 : f32 to vector<8x128xf32>
    %149 = arith.addf %148, %147 : vector<8x128xf32>
    %150 = arith.divf %148, %149 : vector<8x128xf32>
    %151 = vector.extract_strided_slice %130 {offsets = [0, 256], sizes = [8, 128], strides = [1, 1]} : vector<8x384xf32> to vector<8x128xf32>
    %152 = vector.extract_strided_slice %134 {offsets = [0, 256], sizes = [8, 128], strides = [1, 1]} : vector<8x384xf32> to vector<8x128xf32>
    %153 = arith.mulf %142, %152 : vector<8x128xf32>
    %154 = arith.addf %151, %153 : vector<8x128xf32>
    %155 = math.tanh %154 : vector<8x128xf32>
    %cst_43 = arith.constant 1.000000e+00 : f32
    %156 = vector.broadcast %cst_43 : f32 to vector<8x128xf32>
    %157 = arith.subf %156, %150 : vector<8x128xf32>
    %158 = arith.mulf %157, %155 : vector<8x128xf32>
    %159 = arith.mulf %150, %122 : vector<8x128xf32>
    %160 = arith.addf %158, %159 : vector<8x128xf32>
    %161 = arith.index_cast %c3_i32 : i32 to index
    %c0_44 = arith.constant 0 : index
    %c0_45 = arith.constant 0 : index
    %162 = vector.load %arg15[%161, %c0_44, %c0_45] : memref<8x8x128xf32, #tpu.memory_space<vmem>>, vector<1x8x128xf32>
    %163 = vector.shape_cast %162 : vector<1x8x128xf32> to vector<8x128xf32>
    %164 = vector.shape_cast %160 : vector<8x128xf32> to vector<1x8x128xf32>
    tpu.vector_store %arg15[%161, %c0_44, %c0_45], %164 {strides = array<i32>} : memref<8x8x128xf32, #tpu.memory_space<vmem>>, vector<1x8x128xf32>,
    %c4_i32 = arith.constant 4 : i32
    %165 = arith.index_cast %c4_i32 : i32 to index
    %c0_46 = arith.constant 0 : index
    %c0_47 = arith.constant 0 : index
    %166 = vector.load %arg14[%165, %c0_46, %c0_47] : memref<8x8x384xbf16, #tpu.memory_space<vmem>>, vector<1x8x384xbf16>
    %167 = vector.shape_cast %166 : vector<1x8x384xbf16> to vector<8x384xbf16>
    %168 = arith.extf %167 : vector<8x384xbf16> to vector<8x384xf32>
    %169 = arith.truncf %160 : vector<8x128xf32> to vector<8x128xbf16>
    %cst_48 = arith.constant dense<0.000000e+00> : vector<8x384xf32>
    %170 = tpu.matmul %169, %10, %cst_48 {dimension_numbers = #tpu.dot_dimension_numbers<[1], [0], [0], [1], [0, 0, 1, 1], [], []>} : vector<8x128xbf16>, vector<128x384xbf16>, vector<8x384xf32> -> vector<8x384xf32>
    %171 = vector.broadcast %11 : vector<1x384xf32> to vector<8x384xf32>
    %172 = arith.addf %170, %171 : vector<8x384xf32>
    %173 = vector.extract_strided_slice %168 {offsets = [0, 0], sizes = [8, 128], strides = [1, 1]} : vector<8x384xf32> to vector<8x128xf32>
    %174 = vector.extract_strided_slice %172 {offsets = [0, 0], sizes = [8, 128], strides = [1, 1]} : vector<8x384xf32> to vector<8x128xf32>
    %175 = arith.addf %173, %174 : vector<8x128xf32>
    %176 = arith.negf %175 : vector<8x128xf32>
    %177 = math.exp %176 : vector<8x128xf32>
    %cst_49 = arith.constant 1.000000e+00 : f32
    %178 = vector.broadcast %cst_49 : f32 to vector<8x128xf32>
    %179 = arith.addf %178, %177 : vector<8x128xf32>
    %180 = arith.divf %178, %179 : vector<8x128xf32>
    %181 = vector.extract_strided_slice %168 {offsets = [0, 128], sizes = [8, 128], strides = [1, 1]} : vector<8x384xf32> to vector<8x128xf32>
    %182 = vector.extract_strided_slice %172 {offsets = [0, 128], sizes = [8, 128], strides = [1, 1]} : vector<8x384xf32> to vector<8x128xf32>
    %183 = arith.addf %181, %182 : vector<8x128xf32>
    %184 = arith.negf %183 : vector<8x128xf32>
    %185 = math.exp %184 : vector<8x128xf32>
    %cst_50 = arith.constant 1.000000e+00 : f32
    %186 = vector.broadcast %cst_50 : f32 to vector<8x128xf32>
    %187 = arith.addf %186, %185 : vector<8x128xf32>
    %188 = arith.divf %186, %187 : vector<8x128xf32>
    %189 = vector.extract_strided_slice %168 {offsets = [0, 256], sizes = [8, 128], strides = [1, 1]} : vector<8x384xf32> to vector<8x128xf32>
    %190 = vector.extract_strided_slice %172 {offsets = [0, 256], sizes = [8, 128], strides = [1, 1]} : vector<8x384xf32> to vector<8x128xf32>
    %191 = arith.mulf %180, %190 : vector<8x128xf32>
    %192 = arith.addf %189, %191 : vector<8x128xf32>
    %193 = math.tanh %192 : vector<8x128xf32>
    %cst_51 = arith.constant 1.000000e+00 : f32
    %194 = vector.broadcast %cst_51 : f32 to vector<8x128xf32>
    %195 = arith.subf %194, %188 : vector<8x128xf32>
    %196 = arith.mulf %195, %193 : vector<8x128xf32>
    %197 = arith.mulf %188, %160 : vector<8x128xf32>
    %198 = arith.addf %196, %197 : vector<8x128xf32>
    %199 = arith.index_cast %c4_i32 : i32 to index
    %c0_52 = arith.constant 0 : index
    %c0_53 = arith.constant 0 : index
    %200 = vector.load %arg15[%199, %c0_52, %c0_53] : memref<8x8x128xf32, #tpu.memory_space<vmem>>, vector<1x8x128xf32>
    %201 = vector.shape_cast %200 : vector<1x8x128xf32> to vector<8x128xf32>
    %202 = vector.shape_cast %198 : vector<8x128xf32> to vector<1x8x128xf32>
    tpu.vector_store %arg15[%199, %c0_52, %c0_53], %202 {strides = array<i32>} : memref<8x8x128xf32, #tpu.memory_space<vmem>>, vector<1x8x128xf32>,
    %c5_i32 = arith.constant 5 : i32
    %203 = arith.index_cast %c5_i32 : i32 to index
    %c0_54 = arith.constant 0 : index
    %c0_55 = arith.constant 0 : index
    %204 = vector.load %arg14[%203, %c0_54, %c0_55] : memref<8x8x384xbf16, #tpu.memory_space<vmem>>, vector<1x8x384xbf16>
    %205 = vector.shape_cast %204 : vector<1x8x384xbf16> to vector<8x384xbf16>
    %206 = arith.extf %205 : vector<8x384xbf16> to vector<8x384xf32>
    %207 = arith.truncf %198 : vector<8x128xf32> to vector<8x128xbf16>
    %cst_56 = arith.constant dense<0.000000e+00> : vector<8x384xf32>
    %208 = tpu.matmul %207, %10, %cst_56 {dimension_numbers = #tpu.dot_dimension_numbers<[1], [0], [0], [1], [0, 0, 1, 1], [], []>} : vector<8x128xbf16>, vector<128x384xbf16>, vector<8x384xf32> -> vector<8x384xf32>
    %209 = vector.broadcast %11 : vector<1x384xf32> to vector<8x384xf32>
    %210 = arith.addf %208, %209 : vector<8x384xf32>
    %211 = vector.extract_strided_slice %206 {offsets = [0, 0], sizes = [8, 128], strides = [1, 1]} : vector<8x384xf32> to vector<8x128xf32>
    %212 = vector.extract_strided_slice %210 {offsets = [0, 0], sizes = [8, 128], strides = [1, 1]} : vector<8x384xf32> to vector<8x128xf32>
    %213 = arith.addf %211, %212 : vector<8x128xf32>
    %214 = arith.negf %213 : vector<8x128xf32>
    %215 = math.exp %214 : vector<8x128xf32>
    %cst_57 = arith.constant 1.000000e+00 : f32
    %216 = vector.broadcast %cst_57 : f32 to vector<8x128xf32>
    %217 = arith.addf %216, %215 : vector<8x128xf32>
    %218 = arith.divf %216, %217 : vector<8x128xf32>
    %219 = vector.extract_strided_slice %206 {offsets = [0, 128], sizes = [8, 128], strides = [1, 1]} : vector<8x384xf32> to vector<8x128xf32>
    %220 = vector.extract_strided_slice %210 {offsets = [0, 128], sizes = [8, 128], strides = [1, 1]} : vector<8x384xf32> to vector<8x128xf32>
    %221 = arith.addf %219, %220 : vector<8x128xf32>
    %222 = arith.negf %221 : vector<8x128xf32>
    %223 = math.exp %222 : vector<8x128xf32>
    %cst_58 = arith.constant 1.000000e+00 : f32
    %224 = vector.broadcast %cst_58 : f32 to vector<8x128xf32>
    %225 = arith.addf %224, %223 : vector<8x128xf32>
    %226 = arith.divf %224, %225 : vector<8x128xf32>
    %227 = vector.extract_strided_slice %206 {offsets = [0, 256], sizes = [8, 128], strides = [1, 1]} : vector<8x384xf32> to vector<8x128xf32>
    %228 = vector.extract_strided_slice %210 {offsets = [0, 256], sizes = [8, 128], strides = [1, 1]} : vector<8x384xf32> to vector<8x128xf32>
    %229 = arith.mulf %218, %228 : vector<8x128xf32>
    %230 = arith.addf %227, %229 : vector<8x128xf32>
    %231 = math.tanh %230 : vector<8x128xf32>
    %cst_59 = arith.constant 1.000000e+00 : f32
    %232 = vector.broadcast %cst_59 : f32 to vector<8x128xf32>
    %233 = arith.subf %232, %226 : vector<8x128xf32>
    %234 = arith.mulf %233, %231 : vector<8x128xf32>
    %235 = arith.mulf %226, %198 : vector<8x128xf32>
    %236 = arith.addf %234, %235 : vector<8x128xf32>
    %237 = arith.index_cast %c5_i32 : i32 to index
    %c0_60 = arith.constant 0 : index
    %c0_61 = arith.constant 0 : index
    %238 = vector.load %arg15[%237, %c0_60, %c0_61] : memref<8x8x128xf32, #tpu.memory_space<vmem>>, vector<1x8x128xf32>
    %239 = vector.shape_cast %238 : vector<1x8x128xf32> to vector<8x128xf32>
    %240 = vector.shape_cast %236 : vector<8x128xf32> to vector<1x8x128xf32>
    tpu.vector_store %arg15[%237, %c0_60, %c0_61], %240 {strides = array<i32>} : memref<8x8x128xf32, #tpu.memory_space<vmem>>, vector<1x8x128xf32>,
    %c6_i32 = arith.constant 6 : i32
    %241 = arith.index_cast %c6_i32 : i32 to index
    %c0_62 = arith.constant 0 : index
    %c0_63 = arith.constant 0 : index
    %242 = vector.load %arg14[%241, %c0_62, %c0_63] : memref<8x8x384xbf16, #tpu.memory_space<vmem>>, vector<1x8x384xbf16>
    %243 = vector.shape_cast %242 : vector<1x8x384xbf16> to vector<8x384xbf16>
    %244 = arith.extf %243 : vector<8x384xbf16> to vector<8x384xf32>
    %245 = arith.truncf %236 : vector<8x128xf32> to vector<8x128xbf16>
    %cst_64 = arith.constant dense<0.000000e+00> : vector<8x384xf32>
    %246 = tpu.matmul %245, %10, %cst_64 {dimension_numbers = #tpu.dot_dimension_numbers<[1], [0], [0], [1], [0, 0, 1, 1], [], []>} : vector<8x128xbf16>, vector<128x384xbf16>, vector<8x384xf32> -> vector<8x384xf32>
    %247 = vector.broadcast %11 : vector<1x384xf32> to vector<8x384xf32>
    %248 = arith.addf %246, %247 : vector<8x384xf32>
    %249 = vector.extract_strided_slice %244 {offsets = [0, 0], sizes = [8, 128], strides = [1, 1]} : vector<8x384xf32> to vector<8x128xf32>
    %250 = vector.extract_strided_slice %248 {offsets = [0, 0], sizes = [8, 128], strides = [1, 1]} : vector<8x384xf32> to vector<8x128xf32>
    %251 = arith.addf %249, %250 : vector<8x128xf32>
    %252 = arith.negf %251 : vector<8x128xf32>
    %253 = math.exp %252 : vector<8x128xf32>
    %cst_65 = arith.constant 1.000000e+00 : f32
    %254 = vector.broadcast %cst_65 : f32 to vector<8x128xf32>
    %255 = arith.addf %254, %253 : vector<8x128xf32>
    %256 = arith.divf %254, %255 : vector<8x128xf32>
    %257 = vector.extract_strided_slice %244 {offsets = [0, 128], sizes = [8, 128], strides = [1, 1]} : vector<8x384xf32> to vector<8x128xf32>
    %258 = vector.extract_strided_slice %248 {offsets = [0, 128], sizes = [8, 128], strides = [1, 1]} : vector<8x384xf32> to vector<8x128xf32>
    %259 = arith.addf %257, %258 : vector<8x128xf32>
    %260 = arith.negf %259 : vector<8x128xf32>
    %261 = math.exp %260 : vector<8x128xf32>
    %cst_66 = arith.constant 1.000000e+00 : f32
    %262 = vector.broadcast %cst_66 : f32 to vector<8x128xf32>
    %263 = arith.addf %262, %261 : vector<8x128xf32>
    %264 = arith.divf %262, %263 : vector<8x128xf32>
    %265 = vector.extract_strided_slice %244 {offsets = [0, 256], sizes = [8, 128], strides = [1, 1]} : vector<8x384xf32> to vector<8x128xf32>
    %266 = vector.extract_strided_slice %248 {offsets = [0, 256], sizes = [8, 128], strides = [1, 1]} : vector<8x384xf32> to vector<8x128xf32>
    %267 = arith.mulf %256, %266 : vector<8x128xf32>
    %268 = arith.addf %265, %267 : vector<8x128xf32>
    %269 = math.tanh %268 : vector<8x128xf32>
    %cst_67 = arith.constant 1.000000e+00 : f32
    %270 = vector.broadcast %cst_67 : f32 to vector<8x128xf32>
    %271 = arith.subf %270, %264 : vector<8x128xf32>
    %272 = arith.mulf %271, %269 : vector<8x128xf32>
    %273 = arith.mulf %264, %236 : vector<8x128xf32>
    %274 = arith.addf %272, %273 : vector<8x128xf32>
    %275 = arith.index_cast %c6_i32 : i32 to index
    %c0_68 = arith.constant 0 : index
    %c0_69 = arith.constant 0 : index
    %276 = vector.load %arg15[%275, %c0_68, %c0_69] : memref<8x8x128xf32, #tpu.memory_space<vmem>>, vector<1x8x128xf32>
    %277 = vector.shape_cast %276 : vector<1x8x128xf32> to vector<8x128xf32>
    %278 = vector.shape_cast %274 : vector<8x128xf32> to vector<1x8x128xf32>
    tpu.vector_store %arg15[%275, %c0_68, %c0_69], %278 {strides = array<i32>} : memref<8x8x128xf32, #tpu.memory_space<vmem>>, vector<1x8x128xf32>,
    %c7_i32 = arith.constant 7 : i32
    %279 = arith.index_cast %c7_i32 : i32 to index
    %c0_70 = arith.constant 0 : index
    %c0_71 = arith.constant 0 : index
    %280 = vector.load %arg14[%279, %c0_70, %c0_71] : memref<8x8x384xbf16, #tpu.memory_space<vmem>>, vector<1x8x384xbf16>
    %281 = vector.shape_cast %280 : vector<1x8x384xbf16> to vector<8x384xbf16>
    %282 = arith.extf %281 : vector<8x384xbf16> to vector<8x384xf32>
    %283 = arith.truncf %274 : vector<8x128xf32> to vector<8x128xbf16>
    %cst_72 = arith.constant dense<0.000000e+00> : vector<8x384xf32>
    %284 = tpu.matmul %283, %10, %cst_72 {dimension_numbers = #tpu.dot_dimension_numbers<[1], [0], [0], [1], [0, 0, 1, 1], [], []>} : vector<8x128xbf16>, vector<128x384xbf16>, vector<8x384xf32> -> vector<8x384xf32>
    %285 = vector.broadcast %11 : vector<1x384xf32> to vector<8x384xf32>
    %286 = arith.addf %284, %285 : vector<8x384xf32>
    %287 = vector.extract_strided_slice %282 {offsets = [0, 0], sizes = [8, 128], strides = [1, 1]} : vector<8x384xf32> to vector<8x128xf32>
    %288 = vector.extract_strided_slice %286 {offsets = [0, 0], sizes = [8, 128], strides = [1, 1]} : vector<8x384xf32> to vector<8x128xf32>
    %289 = arith.addf %287, %288 : vector<8x128xf32>
    %290 = arith.negf %289 : vector<8x128xf32>
    %291 = math.exp %290 : vector<8x128xf32>
    %cst_73 = arith.constant 1.000000e+00 : f32
    %292 = vector.broadcast %cst_73 : f32 to vector<8x128xf32>
    %293 = arith.addf %292, %291 : vector<8x128xf32>
    %294 = arith.divf %292, %293 : vector<8x128xf32>
    %295 = vector.extract_strided_slice %282 {offsets = [0, 128], sizes = [8, 128], strides = [1, 1]} : vector<8x384xf32> to vector<8x128xf32>
    %296 = vector.extract_strided_slice %286 {offsets = [0, 128], sizes = [8, 128], strides = [1, 1]} : vector<8x384xf32> to vector<8x128xf32>
    %297 = arith.addf %295, %296 : vector<8x128xf32>
    %298 = arith.negf %297 : vector<8x128xf32>
    %299 = math.exp %298 : vector<8x128xf32>
    %cst_74 = arith.constant 1.000000e+00 : f32
    %300 = vector.broadcast %cst_74 : f32 to vector<8x128xf32>
    %301 = arith.addf %300, %299 : vector<8x128xf32>
    %302 = arith.divf %300, %301 : vector<8x128xf32>
    %303 = vector.extract_strided_slice %282 {offsets = [0, 256], sizes = [8, 128], strides = [1, 1]} : vector<8x384xf32> to vector<8x128xf32>
    %304 = vector.extract_strided_slice %286 {offsets = [0, 256], sizes = [8, 128], strides = [1, 1]} : vector<8x384xf32> to vector<8x128xf32>
    %305 = arith.mulf %294, %304 : vector<8x128xf32>
    %306 = arith.addf %303, %305 : vector<8x128xf32>
    %307 = math.tanh %306 : vector<8x128xf32>
    %cst_75 = arith.constant 1.000000e+00 : f32
    %308 = vector.broadcast %cst_75 : f32 to vector<8x128xf32>
    %309 = arith.subf %308, %302 : vector<8x128xf32>
    %310 = arith.mulf %309, %307 : vector<8x128xf32>
    %311 = arith.mulf %302, %274 : vector<8x128xf32>
    %312 = arith.addf %310, %311 : vector<8x128xf32>
    %313 = arith.index_cast %c7_i32 : i32 to index
    %c0_76 = arith.constant 0 : index
    %c0_77 = arith.constant 0 : index
    %314 = vector.load %arg15[%313, %c0_76, %c0_77] : memref<8x8x128xf32, #tpu.memory_space<vmem>>, vector<1x8x128xf32>
    %315 = vector.shape_cast %314 : vector<1x8x128xf32> to vector<8x128xf32>
    %316 = vector.shape_cast %312 : vector<8x128xf32> to vector<1x8x128xf32>
    tpu.vector_store %arg15[%313, %c0_76, %c0_77], %316 {strides = array<i32>} : memref<8x8x128xf32, #tpu.memory_space<vmem>>, vector<1x8x128xf32>,
    %c8_i32 = arith.constant 8 : i32
    %c0_78 = arith.constant 0 : index
    %c0_79 = arith.constant 0 : index
    %c0_80 = arith.constant 0 : index
    %317 = vector.load %arg15[%c0_78, %c0_79, %c0_80] : memref<8x8x128xf32, #tpu.memory_space<vmem>>, vector<8x8x128xf32>
    %318 = vector.shape_cast %317 : vector<8x8x128xf32> to vector<64x128xf32>
    %319 = arith.truncf %318 : vector<64x128xf32> to vector<64x128xbf16>
    %c0_81 = arith.constant 0 : index
    %c0_82 = arith.constant 0 : index
    %320 = vector.load %arg6[%c0_81, %c0_82] : memref<128x128xbf16, #tpu.memory_space<vmem>>, vector<128x128xbf16>
    %cst_83 = arith.constant dense<0.000000e+00> : vector<64x128xf32>
    %321 = tpu.matmul %319, %320, %cst_83 {dimension_numbers = #tpu.dot_dimension_numbers<[1], [0], [0], [1], [0, 0, 1, 1], [], []>} : vector<64x128xbf16>, vector<128x128xbf16>, vector<64x128xf32> -> vector<64x128xf32>
    %c0_84 = arith.constant 0 : index
    %c0_85 = arith.constant 0 : index
    %322 = vector.load %arg7[%c0_84, %c0_85] : memref<1x128xf32, #tpu.memory_space<vmem>>, vector<1x128xf32>
    %323 = vector.broadcast %322 : vector<1x128xf32> to vector<64x128xf32>
    %324 = arith.addf %321, %323 : vector<64x128xf32>
    %cst_86 = arith.constant 0.000000e+00 : f32
    %325 = vector.broadcast %cst_86 : f32 to vector<64x128xf32>
    %326 = arith.cmpf oge, %324, %325 : vector<64x128xf32>
    %cst_87 = arith.constant 0.00999999977 : f32
    %327 = vector.broadcast %cst_87 : f32 to vector<64x128xf32>
    %328 = arith.mulf %327, %324 : vector<64x128xf32>
    %329 = arith.select %326, %324, %328 : vector<64x128xi1>, vector<64x128xf32>
    %330 = arith.truncf %329 : vector<64x128xf32> to vector<64x128xbf16>
    %c0_88 = arith.constant 0 : index
    %c0_89 = arith.constant 0 : index
    %331 = vector.load %arg8[%c0_88, %c0_89] : memref<128x128xbf16, #tpu.memory_space<vmem>>, vector<128x128xbf16>
    %cst_90 = arith.constant dense<0.000000e+00> : vector<64x128xf32>
    %332 = tpu.matmul %330, %331, %cst_90 {dimension_numbers = #tpu.dot_dimension_numbers<[1], [0], [0], [1], [0, 0, 1, 1], [], []>} : vector<64x128xbf16>, vector<128x128xbf16>, vector<64x128xf32> -> vector<64x128xf32>
    %c0_91 = arith.constant 0 : index
    %c0_92 = arith.constant 0 : index
    %333 = vector.load %arg9[%c0_91, %c0_92] : memref<1x128xf32, #tpu.memory_space<vmem>>, vector<1x128xf32>
    %334 = vector.broadcast %333 : vector<1x128xf32> to vector<64x128xf32>
    %335 = arith.addf %332, %334 : vector<64x128xf32>
    %336 = vector.shape_cast %335 : vector<64x128xf32> to vector<8x8x128xf32>
    %337 = arith.truncf %336 : vector<8x8x128xf32> to vector<8x8x128xbf16>
    %c0_93 = arith.constant 0 : index
    %c0_94 = arith.constant 0 : index
    %c0_95 = arith.constant 0 : index
    %338 = vector.load %arg13[%c0_93, %c0_94, %c0_95] : memref<8x8x128xbf16, #tpu.memory_space<vmem>>, vector<8x8x128xbf16>
    tpu.vector_store %arg13[%c0_93, %c0_94, %c0_95], %337 {strides = array<i32>} : memref<8x8x128xbf16, #tpu.memory_space<vmem>>, vector<8x8x128xbf16>,
    %c0_96 = arith.constant 0 : index
    %c0_97 = arith.constant 0 : index
    %339 = vector.load %arg10[%c0_96, %c0_97] : memref<1x128xf32, #tpu.memory_space<vmem>>, vector<1x128xf32>
    %340 = vector.shape_cast %339 : vector<1x128xf32> to vector<1x1x128xf32>
    %341 = vector.broadcast %340 : vector<1x1x128xf32> to vector<8x8x128xf32>
    %342 = arith.mulf %336, %341 : vector<8x8x128xf32>
    %cst_98 = arith.constant dense<0.000000e+00> : vector<8x8xf32>
    %343 = vector.multi_reduction <add>, %342, %cst_98 [2] : vector<8x8x128xf32> to vector<8x8xf32>
    %344 = vector.shape_cast %343 : vector<8x8xf32> to vector<8x8x1xf32>
    %345 = vector.broadcast %344 : vector<8x8x1xf32> to vector<8x8x128xf32>
    %346 = arith.mulf %317, %345 : vector<8x8x128xf32>
    %cst_99 = arith.constant dense<0.000000e+00> : vector<8x128xf32>
    %347 = vector.multi_reduction <add>, %346, %cst_99 [0] : vector<8x8x128xf32> to vector<8x128xf32>
    %c0_100 = arith.constant 0 : index
    %c0_101 = arith.constant 0 : index
    %348 = memref.load %arg11[%c0_100, %c0_101] : memref<1x1xf32, #tpu.memory_space<smem>>
    %349 = vector.broadcast %348 : f32 to vector<8x128xf32>
    %350 = arith.addf %347, %349 : vector<8x128xf32>
    %c0_102 = arith.constant 0 : index
    %c0_103 = arith.constant 0 : index
    %351 = vector.load %arg12[%c0_102, %c0_103] : memref<8x128xf32, #tpu.memory_space<vmem>>, vector<8x128xf32>
    tpu.vector_store %arg12[%c0_102, %c0_103], %350 {strides = array<i32>} : memref<8x128xf32, #tpu.memory_space<vmem>>, vector<8x128xf32>,
    return
  }
  func.func @transform_0(%arg0: i32) -> (i32, i32, i32) {
    %c0_i32 = arith.constant 0 : i32
    %c0_i32_0 = arith.constant 0 : i32
    %c0_i32_1 = arith.constant 0 : i32
    return %c0_i32, %arg0, %c0_i32_0 : i32, i32, i32
  }
  func.func @transform_1(%arg0: i32) -> (i32, i32) {
    %c0_i32 = arith.constant 0 : i32
    %c0_i32_0 = arith.constant 0 : i32
    %c0_i32_1 = arith.constant 0 : i32
    return %c0_i32, %c0_i32_0 : i32, i32
  }
  func.func @transform_2(%arg0: i32) -> (i32, i32) {
    %c0_i32 = arith.constant 0 : i32
    %c0_i32_0 = arith.constant 0 : i32
    %c0_i32_1 = arith.constant 0 : i32
    return %c0_i32, %c0_i32_0 : i32, i32
  }
  func.func @transform_3(%arg0: i32) -> (i32, i32) {
    %c0_i32 = arith.constant 0 : i32
    %c0_i32_0 = arith.constant 0 : i32
    %c0_i32_1 = arith.constant 0 : i32
    return %c0_i32, %c0_i32_0 : i32, i32
  }
  func.func @transform_4(%arg0: i32) -> (i32, i32) {
    %c0_i32 = arith.constant 0 : i32
    %c0_i32_0 = arith.constant 0 : i32
    %c0_i32_1 = arith.constant 0 : i32
    return %c0_i32, %c0_i32_0 : i32, i32
  }
  func.func @transform_5(%arg0: i32) -> (i32, i32) {
    %c0_i32 = arith.constant 0 : i32
    %c0_i32_0 = arith.constant 0 : i32
    %c0_i32_1 = arith.constant 0 : i32
    return %c0_i32, %c0_i32_0 : i32, i32
  }
  func.func @transform_6(%arg0: i32) -> (i32, i32) {
    %c0_i32 = arith.constant 0 : i32
    %c0_i32_0 = arith.constant 0 : i32
    %c0_i32_1 = arith.constant 0 : i32
    return %c0_i32, %c0_i32_0 : i32, i32
  }
  func.func @transform_7(%arg0: i32) -> (i32, i32) {
    %c0_i32 = arith.constant 0 : i32
    %c0_i32_0 = arith.constant 0 : i32
    %c0_i32_1 = arith.constant 0 : i32
    return %c0_i32, %c0_i32_0 : i32, i32
  }
  func.func @transform_8(%arg0: i32) -> (i32, i32) {
    %c0_i32 = arith.constant 0 : i32
    %c0_i32_0 = arith.constant 0 : i32
    %c0_i32_1 = arith.constant 0 : i32
    return %c0_i32, %c0_i32_0 : i32, i32
  }
  func.func @transform_9(%arg0: i32) -> (i32, i32) {
    %c0_i32 = arith.constant 0 : i32
    %c0_i32_0 = arith.constant 0 : i32
    %c0_i32_1 = arith.constant 0 : i32
    return %c0_i32, %c0_i32_0 : i32, i32
  }
  func.func @transform_10(%arg0: i32) -> (i32, i32) {
    %c0_i32 = arith.constant 0 : i32
    %c0_i32_0 = arith.constant 0 : i32
    %c0_i32_1 = arith.constant 0 : i32
    return %c0_i32, %c0_i32_0 : i32, i32
  }
  func.func @transform_11(%arg0: i32) -> (i32, i32) {
    %c0_i32 = arith.constant 0 : i32
    %c0_i32_0 = arith.constant 0 : i32
    return %arg0, %c0_i32 : i32, i32
  }
  func.func @transform_12(%arg0: i32) -> (i32, i32, i32) {
    %c0_i32 = arith.constant 0 : i32
    %c0_i32_0 = arith.constant 0 : i32
    %c0_i32_1 = arith.constant 0 : i32
    return %c0_i32, %arg0, %c0_i32_0 : i32, i32, i32
  }
}

</mosaic_0001>

<bundles_post_ra>
// kernel: tpu_custom_call.1
= control target key start
LH: loop header
LB: loop body
LE: loop exit
PB: predicated region body
PF: predicated region fallthrough
CT: control target
= control target key end

     0   :  { %19 = vsyncpa [#allocation6], 0  ;;  %s3707_s0 = inlined_call_operand.hbm [shape: bf16[8,8,16], index: 0, kind: input, shape index: {}]   ;;  %s3708_s1 = inlined_call_operand.hbm [shape: bf16[16,384], index: 1, kind: input, shape index: {}]   ;;  %s3709_s2 = inlined_call_operand.hbm [shape: bf16[128,384], index: 2, kind: input, shape index: {}]   ;;  %s3710_s3 = inlined_call_operand.hbm [shape: f32[1,384], index: 3, kind: input, shape index: {}]   ;;  %s3711_s4 = inlined_call_operand.hbm [shape: f32[1,384], index: 4, kind: input, shape index: {}]   ;;  %s3712_s5 = inlined_call_operand.hbm [shape: bf16[128,128], index: 5, kind: input, shape index: {}]   ;;  %s3713_s6 = inlined_call_operand.hbm [shape: f32[1,128], index: 6, kind: input, shape index: {}]   ;;  %s3714_s7 = inlined_call_operand.hbm [shape: bf16[128,128], index: 7, kind: input, shape index: {}]   ;;  %s3715_s8 = inlined_call_operand.hbm [shape: f32[1,128], index: 8, kind: input, shape index: {}]   ;;  %s3716_s9 = inlined_call_operand.hbm [shape: f32[1,128], index: 9, kind: input, shape index: {}]   ;;  %s3717_s10 = inlined_call_operand.<no memory space> [shape: f32[1,1], index: 10, kind: input, shape index: {}]   ;;  %s3718_s11 = inlined_call_operand.hbm [shape: f32[8,128], index: 11, kind: output, shape index: {0}]   ;;  %s3719_s12 = inlined_call_operand.hbm [shape: bf16[8,8,128], index: 12, kind: output, shape index: {1}]  }
   0x1   :  { %20 = vsyncpa [#allocation9], 0 }
   0x2   :  { %21 = vsyncpa [#allocation12], 0 }
   0x3   :  { %22 = vsyncpa [#allocation15], 0 }
   0x4   :  { %23 = vsyncpa [#allocation18], 0 }
   0x5   :  { %24 = vsyncpa [#allocation21], 0 }
   0x6   :  { %25 = vsyncpa [#allocation7], 0 }
   0x7   :  { %26 = vsyncpa [#allocation24], 0  ;;  %s2889_s21 = smov [#allocation8]   ;;  %s2609_s25 = scalar_lea.hbm %s3708_s1, 384 }
   0x8   :  { %s44_s22 = sshll.u32 %s2889_s21, 4  ;;  %p2610_p0 = scmp.ne.s32.totalorder %s3708_s1, %s2609_s25  ;;  %s45_s22 = int_to_ptr.vmem [resolvable:$true] %s44_s22 }
   0x9   :  { %p2613_p1 = scmp.lt.u32.totalorder %s2609_s25, %s3708_s1 }
   0xb   :  { %p2615_p2 = pnand %p2613_p1, %p2610_p0 }
   0xd   :  { %2618 = shalt.err (!%p2615_p2)
}
   0xe   :  { %s2619_s30 = scalar_lea.vmem %s45_s22, 384  ;;  %p2624_p4 = scmp.lt.s32.totalorder %s45_s22, %s45_s22 }
   0xf   :  { %p2620_p3 = scmp.ne.s32.totalorder %s45_s22, %s2619_s30  ;;  %p2625_p5 = scmp.lt.s32.totalorder %s2619_s30, %s2619_s30 }
  0x11   :  { %p2626_p6 = por %p2625_p5, %p2624_p4 }
  0x13   :  { %p2627_p7 = pnand %p2626_p6, %p2620_p3 }
  0x15   :  { %2630 = shalt.err (!%p2627_p7)
}
  0x16   :  { %s2890_s13 = smov 192   ;;  %s2891_s14 = smov 12  }
  0x17   :  { %50 = dma.hbm_to_vmem [thread:$0]  %s3708_s1, 384, %s45_s22, [#allocation9], %s2890_s13, %s2890_s13, %s2891_s14  }
  0x18   :  { %s2892_s17 = smov [#allocation11]   ;;  %s2631_s21 = scalar_lea.hbm %s3710_s3, 48 }
  0x19   :  { %s69_s18 = sshll.u32 %s2892_s17, 4  ;;  %p2632_p8 = scmp.ne.s32.totalorder %s3710_s3, %s2631_s21  ;;  %s70_s18 = int_to_ptr.vmem [resolvable:$true] %s69_s18 }
  0x1a   :  { %p2635_p9 = scmp.lt.u32.totalorder %s2631_s21, %s3710_s3 }
  0x1c   :  { %p2637_p10 = pnand %p2635_p9, %p2632_p8 }
  0x1e   :  { %2640 = shalt.err (!%p2637_p10)
}
  0x1f   :  { %s2641_s27 = scalar_lea.vmem %s70_s18, 48  ;;  %s2645_s1 = scalar_lea.vmem %s70_s18, 64 }
  0x20   :  { %p2642_p11 = scmp.ne.s32.totalorder %s70_s18, %s2641_s27  ;;  %p2646_p12 = scmp.lt.s32.totalorder %s70_s18, %s70_s18 }
  0x21   :  { %p2647_p13 = scmp.lt.s32.totalorder %s2645_s1, %s2641_s27 }
  0x23   :  { %p2648_p0 = por %p2647_p13, %p2646_p12 }
  0x25   :  { %p2649_p1 = pnand %p2648_p0, %p2642_p11 }
  0x27   :  { %2652 = shalt.err (!%p2649_p1)
}
  0x28   :  { %72 = dma.hbm_to_vmem [thread:$0]  %s3710_s3, 48, %s70_s18, [#allocation12]  }
  0x29   :  { %s2893_s29 = smov [#allocation14]   ;;  %s2894_s15 = smov [#allocation17]  }
  0x2a   :  { %s88_s30 = sshll.u32 %s2893_s29, 4  ;;  %s110_s16 = sshll.u32 %s2894_s15, 4  ;;  %s89_s30 = int_to_ptr.vmem [resolvable:$true] %s88_s30  ;;  %s3000_s16 = int_to_ptr.vmem [resolvable:$true] %s110_s16 }
  0x2b   :  { %s2653_s20 = scalar_lea.hbm %s3712_s5, 1024 }
  0x2c   :  { %p2654_p2 = scmp.ne.s32.totalorder %s3712_s5, %s2653_s20  ;;  %p2657_p3 = scmp.lt.u32.totalorder %s2653_s20, %s3712_s5 }
  0x2e   :  { %p2659_p4 = pnand %p2657_p3, %p2654_p2 }
  0x30   :  { %2662 = shalt.err (!%p2659_p4)
}
  0x31   :  { %s2663_s3 = scalar_lea.vmem %s89_s30, 1024  ;;  %p2668_p6 = scmp.lt.s32.totalorder %s89_s30, %s89_s30 }
  0x32   :  { %p2664_p5 = scmp.ne.s32.totalorder %s89_s30, %s2663_s3  ;;  %p2669_p7 = scmp.lt.s32.totalorder %s2663_s3, %s2663_s3 }
  0x34   :  { %p2670_p8 = por %p2669_p7, %p2668_p6 }
  0x36   :  { %p2671_p9 = pnand %p2670_p8, %p2664_p5 }
  0x38   :  { %2674 = shalt.err (!%p2671_p9)
}
  0x39   :  { %s2895_s18 = smov 64   ;;  %s2896_s26 = smov 4  }
  0x3a   :  { %94 = dma.hbm_to_vmem [thread:$0]  %s3712_s5, 1024, %s89_s30, [#allocation15], %s2895_s18, %s2895_s18, %s2896_s26  }
  0x3b   :  { %s2675_s29 = scalar_lea.hbm %s3714_s7, 1024 }
  0x3c   :  { %p2676_p10 = scmp.ne.s32.totalorder %s3714_s7, %s2675_s29  ;;  %p2679_p11 = scmp.lt.u32.totalorder %s2675_s29, %s3714_s7 }
  0x3e   :  { %p2681_p12 = pnand %p2679_p11, %p2676_p10 }
  0x40   :  { %2684 = shalt.err (!%p2681_p12)
}
  0x41   :  { %s2685_s21 = scalar_lea.vmem %s3000_s16, 1024  ;;  %p2690_p0 = scmp.lt.s32.totalorder %s3000_s16, %s3000_s16 }
  0x42   :  { %p2686_p13 = scmp.ne.s32.totalorder %s3000_s16, %s2685_s21  ;;  %p2691_p1 = scmp.lt.s32.totalorder %s2685_s21, %s2685_s21 }
  0x44   :  { %p2692_p2 = por %p2691_p1, %p2690_p0 }
  0x46   :  { %p2693_p3 = pnand %p2692_p2, %p2686_p13 }
  0x48   :  { %2696 = shalt.err (!%p2693_p3)
}
  0x49   :  { %116 = dma.hbm_to_vmem [thread:$0]  %s3714_s7, 1024, %s3000_s16, [#allocation18], %s2895_s18, %s2895_s18, %s2896_s26  }
  0x4a   :  { %s2897_s23 = smov [#allocation5]   ;;  %s2898_s25 = smov [#allocation10]  }
  0x4b   :  { %s32_s24 = sshll.u32 %s2897_s23, 4  ;;  %s56_s3 = sshll.u32 %s2898_s25, 4  ;;  %s33_s24 = int_to_ptr.vmem [resolvable:$true] %s32_s24  ;;  %s3037_s3 = int_to_ptr.vmem [resolvable:$true] %s56_s3 }
  0x4c   :  { %s2697_s22 = scalar_lea.hbm %s3707_s0, 512 }
  0x4d   :  { %p2698_p4 = scmp.ne.s32.totalorder %s3707_s0, %s2697_s22  ;;  %p2701_p5 = scmp.lt.u32.totalorder %s2697_s22, %s3707_s0 }
  0x4f   :  { %p2703_p6 = pnand %p2701_p5, %p2698_p4 }
  0x51   :  { %2706 = shalt.err (!%p2703_p6)
}
  0x52   :  { %s2707_s7 = scalar_lea.vmem %s33_s24, 512  ;;  %p2712_p8 = scmp.lt.s32.totalorder %s33_s24, %s33_s24 }
  0x53   :  { %p2708_p7 = scmp.ne.s32.totalorder %s33_s24, %s2707_s7  ;;  %p2713_p9 = scmp.lt.s32.totalorder %s2707_s7, %s2707_s7 }
  0x55   :  { %p2714_p10 = por %p2713_p9, %p2712_p8 }
  0x57   :  { %p2715_p11 = pnand %p2714_p10, %p2708_p7 }
  0x59   :  { %2718 = shalt.err (!%p2715_p11)
}
  0x5a   :  { %38 = dma.hbm_to_vmem [thread:$0]  %s3707_s0, 512, %s33_s24, [#allocation6], %s2895_s18, %s2895_s18, %s2896_s26  }
  0x5b   :  { %s2719_s5 = scalar_lea.hbm %s3709_s2, 3072 }
  0x5c   :  { %p2720_p12 = scmp.ne.s32.totalorder %s3709_s2, %s2719_s5  ;;  %p2723_p13 = scmp.lt.u32.totalorder %s2719_s5, %s3709_s2 }
  0x5e   :  { %p2725_p0 = pnand %p2723_p13, %p2720_p12 }
  0x60   :  { %2728 = shalt.err (!%p2725_p0)
}
  0x61   :  { %s2729_s1 = scalar_lea.vmem %s3037_s3, 3072  ;;  %p2734_p2 = scmp.lt.s32.totalorder %s3037_s3, %s3037_s3 }
  0x62   :  { %p2730_p1 = scmp.ne.s32.totalorder %s3037_s3, %s2729_s1  ;;  %p2735_p3 = scmp.lt.s32.totalorder %s2729_s1, %s2729_s1 }
  0x64   :  { %p2736_p4 = por %p2735_p3, %p2734_p2 }
  0x66   :  { %p2737_p5 = pnand %p2736_p4, %p2730_p1 }
  0x68   :  { %2740 = shalt.err (!%p2737_p5)
}
  0x69   :  { %62 = dma.hbm_to_vmem [thread:$0]  %s3709_s2, 3072, %s3037_s3, [#allocation9], %s2890_s13, %s2890_s13, %s2891_s14  }
  0x6a   :  { %s2899_s22 = smov [#allocation13]   ;;  %s2900_s29 = smov [#allocation16]  }
  0x6b   :  { %s79_s28 = sshll.u32 %s2899_s22, 4  ;;  %s101_s15 = sshll.u32 %s2900_s29, 4  ;;  %s80_s28 = int_to_ptr.vmem [resolvable:$true] %s79_s28  ;;  %s102_s15 = int_to_ptr.vmem [resolvable:$true] %s101_s15 }
  0x6c   :  { %s2741_s16 = scalar_lea.hbm %s3711_s4, 48 }
  0x6d   :  { %p2742_p6 = scmp.ne.s32.totalorder %s3711_s4, %s2741_s16  ;;  %p2745_p7 = scmp.lt.u32.totalorder %s2741_s16, %s3711_s4 }
  0x6f   :  { %p2747_p8 = pnand %p2745_p7, %p2742_p6 }
  0x71   :  { %2750 = shalt.err (!%p2747_p8)
}
  0x72   :  { %s2751_s2 = scalar_lea.vmem %s80_s28, 48  ;;  %s2755_s13 = scalar_lea.vmem %s80_s28, 64 }
  0x73   :  { %p2752_p9 = scmp.ne.s32.totalorder %s80_s28, %s2751_s2  ;;  %p2756_p10 = scmp.lt.s32.totalorder %s80_s28, %s80_s28 }
  0x74   :  { %p2757_p11 = scmp.lt.s32.totalorder %s2755_s13, %s2751_s2 }
  0x76   :  { %p2758_p12 = por %p2757_p11, %p2756_p10 }
  0x78   :  { %p2759_p13 = pnand %p2758_p12, %p2752_p9 }
  0x7a   :  { %2762 = shalt.err (!%p2759_p13)
}
  0x7b   :  { %82 = dma.hbm_to_vmem [thread:$0]  %s3711_s4, 48, %s80_s28, [#allocation12]  }
  0x7c   :  { %s2763_s25 = scalar_lea.hbm %s3713_s6, 16 }
  0x7d   :  { %p2764_p0 = scmp.ne.s32.totalorder %s3713_s6, %s2763_s25  ;;  %p2767_p1 = scmp.lt.u32.totalorder %s2763_s25, %s3713_s6 }
  0x7f   :  { %p2769_p2 = pnand %p2767_p1, %p2764_p0 }
  0x81   :  { %2772 = shalt.err (!%p2769_p2)
}
  0x82   :  { %s2773_s22 = scalar_lea.vmem %s102_s15, 16  ;;  %s2777_s29 = scalar_lea.vmem %s102_s15, 32 }
  0x83   :  { %p2774_p3 = scmp.ne.s32.totalorder %s102_s15, %s2773_s22  ;;  %p2778_p4 = scmp.lt.s32.totalorder %s102_s15, %s102_s15 }
  0x84   :  { %p2779_p5 = scmp.lt.s32.totalorder %s2777_s29, %s2773_s22 }
  0x86   :  { %p2780_p6 = por %p2779_p5, %p2778_p4 }
  0x88   :  { %p2781_p7 = pnand %p2780_p6, %p2774_p3 }
  0x8a   :  { %2784 = shalt.err (!%p2781_p7)
}
  0x8b   :  { %104 = dma.hbm_to_vmem [thread:$0]  %s3713_s6, 16, %s102_s15, [#allocation15]  }
  0x8c   :  { %s2901_s17 = smov [#allocation19]   ;;  %s2902_s16 = smov [#allocation20]  }
  0x8d   :  { %s123_s7 = sshll.u32 %s2901_s17, 4  ;;  %s133_s19 = sshll.u32 %s2902_s16, 4  ;;  %s124_s7 = int_to_ptr.vmem [resolvable:$true] %s123_s7  ;;  %s134_s19 = int_to_ptr.vmem [resolvable:$true] %s133_s19 }
  0x8e   :  { %s2785_s5 = scalar_lea.hbm %s3715_s8, 16 }
  0x8f   :  { %p2786_p8 = scmp.ne.s32.totalorder %s3715_s8, %s2785_s5  ;;  %p2789_p9 = scmp.lt.u32.totalorder %s2785_s5, %s3715_s8 }
  0x91   :  { %p2791_p10 = pnand %p2789_p9, %p2786_p8 }
  0x93   :  { %2794 = shalt.err (!%p2791_p10)
}
  0x94   :  { %s2795_s6 = scalar_lea.vmem %s124_s7, 16  ;;  %s2799_s15 = scalar_lea.vmem %s124_s7, 32 }
  0x95   :  { %p2796_p11 = scmp.ne.s32.totalorder %s124_s7, %s2795_s6  ;;  %p2800_p12 = scmp.lt.s32.totalorder %s124_s7, %s124_s7 }
  0x96   :  { %p2801_p13 = scmp.lt.s32.totalorder %s2799_s15, %s2795_s6 }
  0x98   :  { %p2802_p0 = por %p2801_p13, %p2800_p12 }
  0x9a   :  { %p2803_p1 = pnand %p2802_p0, %p2796_p11 }
  0x9c   :  { %2806 = shalt.err (!%p2803_p1)
}
  0x9d   :  { %126 = dma.hbm_to_vmem [thread:$0]  %s3715_s8, 16, %s124_s7, [#allocation18]  }
  0x9e   :  { %s2807_s1 = scalar_lea.hbm %s3716_s9, 16 }
  0x9f   :  { %p2808_p2 = scmp.ne.s32.totalorder %s3716_s9, %s2807_s1  ;;  %p2811_p3 = scmp.lt.u32.totalorder %s2807_s1, %s3716_s9 }
  0xa1   :  { %p2813_p4 = pnand %p2811_p3, %p2808_p2 }
  0xa3   :  { %2816 = shalt.err (!%p2813_p4)
}
  0xa4   :  { %s2817_s4 = scalar_lea.vmem %s134_s19, 16  ;;  %s2821_s28 = scalar_lea.vmem %s134_s19, 32 }
  0xa5   :  { %p2818_p5 = scmp.ne.s32.totalorder %s134_s19, %s2817_s4  ;;  %p2822_p6 = scmp.lt.s32.totalorder %s134_s19, %s134_s19 }
  0xa6   :  { %p2823_p7 = scmp.lt.s32.totalorder %s2821_s28, %s2817_s4 }
  0xa8   :  { %p2824_p8 = por %p2823_p7, %p2822_p6 }
  0xaa   :  { %p2825_p9 = pnand %p2824_p8, %p2818_p5 }
  0xac   :  { %2828 = shalt.err (!%p2825_p9)
}
  0xad   :  { %136 = dma.hbm_to_vmem [thread:$0]  %s3716_s9, 16, %s134_s19, [#allocation21]  }
  0xae   :  { %2873 = dma.done.wait [#allocation6], 512  }
  0xaf   :  { %2874 = vsyncadd [#allocation6], 4294966784 }
  0xb0   :  { %2875 = dma.done.wait [#allocation9], 3456  }
  0xb1   :  { %2876 = vsyncadd [#allocation9], 4294963840 }
  0xb2   :  { %2877 = dma.done.wait [#allocation12], 96  }
  0xb3   :  { %2878 = vsyncadd [#allocation12], 4294967200 }
  0xb4   :  { %2879 = dma.done.wait [#allocation15], 1040  }
  0xb5   :  { %2880 = vsyncadd [#allocation15], 4294966256 }
  0xb6   :  { %2881 = dma.done.wait [#allocation18], 1040  }
  0xb7   :  { %2882 = vsyncadd [#allocation18], 4294966256 }
  0xb8   :  { %2883 = dma.done.wait [#allocation21], 16  }
  0xb9   :  { %2884 = vsyncadd [#allocation21], 4294967280  ;;  %v2903_v0 = vmov 0   ;;  %v2449_v1 = vld [vmem:[#allocation8 + $0x4] ss:$12 sps:$4 sm:$0xff]   ;;  %vm235_vm0 = vcmask 130048   ;;  %v184_v33 = vlaneseq }
  0xba   :  { %280 = vmatprep.mubr.bf16.mxu0 %v2903_v0  ;;  %v2451_v2 = vld [vmem:[#allocation8] ss:$12 sps:$4 sm:$0xff]   ;;  %248 = vmatprep.subr.bf16.mxu0 %v2449_v1  ;;  %v3123_v4 = vld [vmem:[#allocation10 + $0x4] ss:$12 sps:$4 sm:$0xff]   ;;  %v3125_v5 = vld [vmem:[#allocation10] ss:$12 sps:$4 sm:$0xff]  }
  0xbb   :  { %v2452_v3 = vld [vmem:[#allocation5] sm:$0xff]   ;;  %249 = vmatpush1.bf16.msra.mxu0 %v2451_v2  ;;  %v3133_v7 = vld [vmem:[#allocation10 + $0x18] ss:$12 sps:$4 sm:$0xff]   ;;  %v3137_v8 = vld [vmem:[#allocation10 + $0x34] ss:$12 sps:$4 sm:$0xff]   ;;  %v2904_v17 = vmov 0.0  }
  0xbc   :  { %v3127_v6 = vld [vmem:[#allocation10 + $0x1c] ss:$12 sps:$4 sm:$0xff]   ;;  %2214 = vmatprep.mubr.msk.bf16.mxu1 %vm235_vm0, %v2452_v3  ;;  %688 = vmatprep.subr.bf16.mxu0 %v3123_v4  ;;  %v2459_v9 = vld [vmem:[#allocation5 + $0x8] sm:$0xff]   ;;  %v3143_v11 = vld [vmem:[#allocation10 + $0x4c] ss:$12 sps:$4 sm:$0xff]   ;;  %vm2905_vm1 = vmmov 0  }
  0xbd   :  { %v3140_v10 = vld [vmem:[#allocation10 + $0x30] ss:$12 sps:$4 sm:$0xff]   ;;  %v3147_v13 = vld [vmem:[#allocation10 + $0x48] ss:$12 sps:$4 sm:$0xff]   ;;  %v3157_v18 = vld [vmem:[#allocation10 + $0x60] ss:$12 sps:$4 sm:$0xff]  }
  0xbe   :  { %1989 = vmatmul.mubr.msk.bf16.vlgmr.msra.gmra.mrb[0].mxu0 %vm235_vm0, %v2452_v3  ;;  %v2473_v12 = vld [vmem:[#allocation8 + $0x8] ss:$12 sps:$4 sm:$0xff]   ;;  %v3153_v15 = vld [vmem:[#allocation10 + $0x8] ss:$12 sps:$4 sm:$0xff]   ;;  %v3164_v20 = vld [vmem:[#allocation10 + $0x20] ss:$12 sps:$4 sm:$0xff]  }
  0xbf   :  { %689 = vmatpush1.bf16.msra.mxu0 %v3125_v5  ;;  %290 = vmatprep.mubr.bf16.mxu0 %v2903_v0  ;;  %v3151_v14 = vld [vmem:[#allocation10 + $0x64] ss:$12 sps:$4 sm:$0xff]   ;;  %v2466_v16 = vld [vmem:[#allocation5 + $0x10] sm:$0xff]   ;;  %v3174_v23 = vld [vmem:[#allocation10 + $0x94] ss:$12 sps:$4 sm:$0xff]   ;;  %v3256_v34 = vshrl.u32 %v184_v33, 7 }
  0xc0   :  { %690 = vmatprep.subr.bf16.mxu0 %v3127_v6  ;;  %2212 = vmatprep.subr.bf16.mxu1 %v2473_v12  ;;  %v3160_v19 = vld [vmem:[#allocation10 + $0x7c] ss:$12 sps:$4 sm:$0xff]   ;;  %v3170_v21 = vld [vmem:[#allocation10 + $0x78] ss:$12 sps:$4 sm:$0xff]   ;;  %v3206_v30 = vld [vmem:[#allocation10 + $0x80] ss:$12 sps:$4 sm:$0xff]  }
  0xc1   :  { %2213 = vmatpush3.bf16.msra.mxu1 %v2473_v12  ;;  %v2474_v22 = vld [vmem:[#allocation5 + $0x18] sm:$0xff]   ;;  %v3176_v24 = vld [vmem:[#allocation10 + $0x90] ss:$12 sps:$4 sm:$0xff]   ;;  %v3181_v26 = vld [vmem:[#allocation10 + $0xac] ss:$12 sps:$4 sm:$0xff]   ;;  %v186_v35 = vsub.s32 0, %v3256_v34 }
  0xc2   :  { %2222 = vmatprep.subr.bf16.mxu1 %v2904_v17  ;;  %v3179_v25 = vld [vmem:[#allocation10 + $0x38] ss:$12 sps:$4 sm:$0xff]   ;;  %v3185_v27 = vld [vmem:[#allocation10 + $0x50] ss:$12 sps:$4 sm:$0xff]   ;;  %v3189_v28 = vld [vmem:[#allocation10 + $0xa8] ss:$12 sps:$4 sm:$0xff]  }
  0xc3   :  { %691 = vmatpush1.bf16.msra.mxu0 %v3133_v7  ;;  %v3198_v29 = vld [vmem:[#allocation10 + $0x68] ss:$12 sps:$4 sm:$0xff]   ;;  %v3214_v31 = vld [vmem:[#allocation10 + $0x98] ss:$12 sps:$4 sm:$0xff]   ;;  %v3220_v32 = vld [vmem:[#allocation10 + $0xb0] ss:$12 sps:$4 sm:$0xff]  }
  0xc4   :  { %692 = vmatprep.subr.bf16.mxu0 %v3137_v8  ;;  %2215 = vmatmul.mubr.msk.bf16.vlgmr.msra.gmra.mrb[0].mxu1 %vm235_vm0, %v2459_v9  ;;  %v182_v36 = vld [vmem:[#allocation11] sm:$0x7]  ;;  %v190_v37 = vsub.s32 1, %v3256_v34  ;;  %v194_v50 = vsub.s32 2, %v3256_v34  ;;  %s2906_s9 = smov [#allocation23]  }
  0xc5   :  { %2223 = vmatpush3.bf16.msra.mxu1 %v3153_v15  ;;  %2218 = vmatprep.mubr.msk.bf16.mxu1 %vm235_vm0, %v2466_v16  ;;  %v3262_v38 = vrot.slane %v182_v36, %v186_v35  ;;  %s1961_s7 = sshll.u32 %s2906_s9, 4  ;;  %s1962_s7 = int_to_ptr.vmem [resolvable:$true] %s1961_s7 }
  0xc6   :  { %1990 = vmatmul.mubr.msk.bf16.gmra.mrb[4].mxu0 %vm235_vm0, %v2459_v9  ;;  %2224 = vmatprep.subr.bf16.mxu1 %v2904_v17  ;;  %v3266_v39 = vrot.slane %v182_v36, %v190_v37  ;;  %v195_v58 = vrot.slane %v182_v36, %v194_v50  ;;  %s2829_s16 = scalar_lea.vmem %s1962_s7, 512  ;;  %p2834_p11 = scmp.lt.s32.totalorder %s1962_s7, %s1962_s7 }
  0xc7   :  { %693 = vmatpush1.bf16.msra.mxu0 %v3140_v10  ;;  %300 = vmatprep.mubr.bf16.mxu0 %v2903_v0  ;;  %p2830_p10 = scmp.ne.s32.totalorder %s1962_s7, %s2829_s16  ;;  %p2835_p12 = scmp.lt.s32.totalorder %s2829_s16, %s2829_s16 }
  0xc8   :  { %694 = vmatprep.subr.bf16.mxu0 %v3143_v11 }
  0xc9   :  { %2225 = vmatpush3.bf16.msra.mxu1 %v3164_v20  ;;  %p2836_p13 = por %p2835_p12, %p2834_p11 }
  0xca   :  { %2226 = vmatprep.subr.bf16.mxu1 %v2904_v17 }
  0xcb   :  { %695 = vmatpush1.bf16.msra.mxu0 %v3147_v13  ;;  %p2837_p0 = pnand %p2836_p13, %p2830_p10 }
  0xcc   :  { %696 = vmatprep.subr.bf16.mxu0 %v3151_v14  ;;  %2219 = vmatmul.mubr.msk.bf16.gmra.mrb[4].mxu1 %vm235_vm0, %v2474_v22 }
  0xcd   :  { %2227 = vmatpush3.bf16.msra.mxu1 %v3179_v25  ;;  %2238 = vmatprep.mubr.msk.bf16.mxu1 %vm2905_vm1, %v2904_v17 }
  0xce   :  { %1991 = vmatmul.mubr.msk.bf16.gmra.mrb[8].mxu0 %vm235_vm0, %v2466_v16  ;;  %2228 = vmatprep.subr.bf16.mxu1 %v2904_v17 }
  0xcf   :  { %697 = vmatpush1.bf16.msra.mxu0 %v3157_v18  ;;  %310 = vmatprep.mubr.bf16.mxu0 %v2903_v0 }
  0xd0   :  { %698 = vmatprep.subr.bf16.mxu0 %v3160_v19 }
  0xd1   :  { %2229 = vmatpush3.bf16.msra.mxu1 %v3185_v27 }
  0xd2   :  { %2230 = vmatprep.subr.bf16.mxu1 %v2904_v17 }
  0xd3   :  { %699 = vmatpush1.bf16.msra.mxu0 %v3170_v21 }
  0xd4   :  { %700 = vmatprep.subr.bf16.mxu0 %v3174_v23 }
  0xd5   :  { %2231 = vmatpush3.bf16.msra.mxu1 %v3198_v29 }
  0xd6   :  { %1992 = vmatmul.mubr.msk.bf16.gmra.mrb[12].mxu0 %vm235_vm0, %v2474_v22  ;;  %2232 = vmatprep.subr.bf16.mxu1 %v2904_v17 }
  0xd7   :  { %701 = vmatpush1.bf16.msra.mxu0 %v3176_v24  ;;  %720 = vmatprep.mubr.bf16.mxu0 %v2903_v0 }
  0xd8   :  { %702 = vmatprep.subr.bf16.mxu0 %v3181_v26 }
  0xd9   :  { %2233 = vmatpush3.bf16.msra.mxu1 %v3206_v30 }
  0xda   :  { %2234 = vmatprep.subr.bf16.mxu1 %v2904_v17 }
  0xdb   :  { %703 = vmatpush1.bf16.msra.mxu0 %v3189_v28 }
  0xdc   :  { %798 = vmatprep.subr.bf16.mxu0 %v3123_v4 }
  0xdd   :  { %2235 = vmatpush3.bf16.msra.mxu1 %v3214_v31 }
  0xde   :  { %721 = vmatmul.mubr.bf16.vlgmr.msra.gmra.mrb[16].mxu0 %v2903_v0  ;;  %2236 = vmatprep.subr.bf16.mxu1 %v2904_v17 }
  0xdf   :  { %799 = vmatpush1.bf16.msra.mxu0 %v3125_v5  ;;  %830 = vmatprep.mubr.bf16.mxu0 %v2903_v0 }
  0xe0   :  { %800 = vmatprep.subr.bf16.mxu0 %v3127_v6 }
  0xe1   :  { %2237 = vmatpush3.bf16.msra.mxu1 %v3220_v32 }
  0xe2   :  { %2242 = vmatprep.subr.bf16.mxu1 %v2904_v17 }
  0xe3   :  { %801 = vmatpush1.bf16.msra.mxu0 %v3133_v7 }
  0xe4   :  { %802 = vmatprep.subr.bf16.mxu0 %v3137_v8  ;;  %2239 = vmatmul.mubr.bf16.vlgmr.msra.gmra.mrb[8].mxu1 %v2903_v0 }
  0xe5   :  { %2243 = vmatpush3.bf16.msra.mxu1 %v3153_v15  ;;  %2258 = vmatprep.mubr.msk.bf16.mxu1 %vm2905_vm1, %v2904_v17 }
  0xe6   :  { %2244 = vmatprep.subr.bf16.mxu1 %v2904_v17 }
  0xe7   :  { %803 = vmatpush1.bf16.msra.mxu0 %v3140_v10 }
  0xe8   :  { %804 = vmatprep.subr.bf16.mxu0 %v3143_v11 }
  0xe9   :  { %2245 = vmatpush3.bf16.msra.mxu1 %v3164_v20 }
  0xea   :  { %2246 = vmatprep.subr.bf16.mxu1 %v2904_v17 }
  0xeb   :  { %805 = vmatpush1.bf16.msra.mxu0 %v3147_v13 }
  0xec   :  { %806 = vmatprep.subr.bf16.mxu0 %v3151_v14 }
  0xed   :  { %2247 = vmatpush3.bf16.msra.mxu1 %v3179_v25 }
  0xee   :  { %2248 = vmatprep.subr.bf16.mxu1 %v2904_v17 }
  0xef   :  { %807 = vmatpush1.bf16.msra.mxu0 %v3157_v18 }
  0xf0   :  { %808 = vmatprep.subr.bf16.mxu0 %v3160_v19 }
  0xf1   :  { %2249 = vmatpush3.bf16.msra.mxu1 %v3185_v27 }
  0xf2   :  { %2250 = vmatprep.subr.bf16.mxu1 %v2904_v17 }
  0xf3   :  { %809 = vmatpush1.bf16.msra.mxu0 %v3170_v21 }
  0xf4   :  { %810 = vmatprep.subr.bf16.mxu0 %v3174_v23 }
  0xf5   :  { %2251 = vmatpush3.bf16.msra.mxu1 %v3198_v29 }
  0xf6   :  { %2252 = vmatprep.subr.bf16.mxu1 %v2904_v17 }
  0xf7   :  { %811 = vmatpush1.bf16.msra.mxu0 %v3176_v24 }
  0xf8   :  { %812 = vmatprep.subr.bf16.mxu0 %v3181_v26 }
  0xf9   :  { %2253 = vmatpush3.bf16.msra.mxu1 %v3206_v30 }
  0xfa   :  { %2254 = vmatprep.subr.bf16.mxu1 %v2904_v17 }
  0xfb   :  { %813 = vmatpush1.bf16.msra.mxu0 %v3189_v28 }
  0xfc   :  { %909 = vmatprep.subr.bf16.mxu0 %v3123_v4 }
  0xfd   :  { %2255 = vmatpush3.bf16.msra.mxu1 %v3214_v31 }
  0xfe   :  { %2256 = vmatprep.subr.bf16.mxu1 %v2904_v17 }
 0x101   :  { %2257 = vmatpush3.bf16.msra.mxu1 %v3220_v32 }
 0x102   :  { %2262 = vmatprep.subr.bf16.mxu1 %v2904_v17 }
 0x191   :  { %v282_v40 = vpop.f32.mrb[0].mxu0 }
 0x192   :  { %v283_v41 = vadd.f32 %v282_v40, %v3262_v38  ;;  %v284_v42 = vpop.f32.mrb[1].mxu0 }
 0x193   :  { %v285_v43 = vadd.f32 %v284_v42, %v3266_v39  ;;  %v286_v44 = vpop.f32.mrb[2].mxu0 }
 0x194   :  { %v287_v45 = vadd.f32 %v286_v44, %v3262_v38  ;;  %v288_v46 = vpop.f32.mrb[3].mxu0 }
 0x195   :  { %v3271_v47 = vpack.c.bf16 %v285_v43, %v283_v41  ;;  %v289_v48 = vadd.f32 %v288_v46, %v3266_v39 }
 0x197   :  { %v3274_v49 = vpack.c.bf16 %v289_v48, %v287_v45  ;;  %v2216_v62 = vpop.f32.mrb[0].mxu1 }
 0x198   :  { %v364_v63 = vadd.f32 %v2216_v62, %v195_v58  ;;  %v355_v1 = vpop.f32.mrb[1].mxu1 }
 0x199   :  { %v292_v51 = vpop.f32.mrb[4].mxu0  ;;  %v356_v3 = vadd.f32 %v355_v1, %v195_v58  ;;  %v2217_v9 = vpop.f32.mrb[2].mxu1 }
 0x19a   :  { %v293_v52 = vadd.f32 %v292_v51, %v3262_v38  ;;  %v294_v53 = vpop.f32.mrb[5].mxu0  ;;  %v2077_v22 = vpack.c.bf16 %v364_v63, %v364_v63  ;;  %v367_v33 = vadd.f32 %v2217_v9, %v195_v58  ;;  %v358_v40 = vpop.f32.mrb[3].mxu1 }
 0x19b   :  { %v295_v54 = vadd.f32 %v294_v53, %v3266_v39  ;;  %v296_v55 = vpop.f32.mrb[6].mxu0  ;;  %v2073_v42 = vpack.c.bf16 %v356_v3, %v356_v3  ;;  %v359_v43 = vadd.f32 %v358_v40, %v195_v58 }
 0x19c   :  { %v297_v56 = vadd.f32 %v296_v55, %v3262_v38  ;;  %v298_v57 = vpop.f32.mrb[7].mxu0  ;;  %495 = vst [vmem:[#allocation2 + $0x20] sm:$0xf] %v2077_v22  ;;  %v2079_v46 = vpack.c.bf16 %v367_v33, %v367_v33  ;;  %v538_v22 = vld [vmem:[#allocation13] sm:$0x7] }
 0x19d   :  { %v3282_v59 = vpack.c.bf16 %v295_v54, %v293_v52  ;;  %v299_v60 = vadd.f32 %v298_v57, %v3266_v39  ;;  %491 = vst [vmem:[#allocation2 + $0x8] sm:$0xf] %v2073_v42  ;;  %v2075_v52 = vpack.c.bf16 %v359_v43, %v359_v43 }
 0x19e   :  { %497 = vst [vmem:[#allocation2 + $0x2c] sm:$0xf] %v2079_v46  ;;  %v3303_v46 = vrot.slane %v538_v22, %v186_v35 }
 0x19f   :  { %v3285_v61 = vpack.c.bf16 %v299_v60, %v297_v56  ;;  %493 = vst [vmem:[#allocation2 + $0x14] sm:$0xf] %v2075_v52  ;;  %v2220_v54 = vpop.f32.mrb[4].mxu1  ;;  %v541_v52 = vunpack.c.l.bf16 %v3271_v47 }
 0x1a0   :  { %v380_v55 = vadd.f32 %v2220_v54, %v195_v58  ;;  %v371_v56 = vpop.f32.mrb[5].mxu1 }
 0x1a1   :  { %v302_v2 = vpop.f32.mrb[8].mxu0  ;;  %v372_v60 = vadd.f32 %v371_v56, %v195_v58  ;;  %v2221_v62 = vpop.f32.mrb[6].mxu1 }
 0x1a2   :  { %v303_v12 = vadd.f32 %v302_v2, %v3262_v38  ;;  %v304_v16 = vpop.f32.mrb[9].mxu0  ;;  %v2085_v2 = vpack.c.bf16 %v380_v55, %v380_v55  ;;  %v383_v3 = vadd.f32 %v2221_v62, %v195_v58  ;;  %v374_v9 = vpop.f32.mrb[7].mxu1  ;;  %v542_v55 = vunpack.c.h.bf16 %v3271_v47 }
 0x1a3   :  { %v305_v36 = vadd.f32 %v304_v16, %v3266_v39  ;;  %v306_v41 = vpop.f32.mrb[10].mxu0  ;;  %v2081_v33 = vpack.c.bf16 %v372_v60, %v372_v60  ;;  %v375_v40 = vadd.f32 %v374_v9, %v195_v58  ;;  %v3307_v58 = vrot.slane %v538_v22, %v190_v37 }
 0x1a4   :  { %v307_v44 = vadd.f32 %v306_v41, %v3262_v38  ;;  %v308_v45 = vpop.f32.mrb[11].mxu0  ;;  %503 = vst [vmem:[#allocation2 + $0x50] sm:$0xf] %v2085_v2  ;;  %v2087_v42 = vpack.c.bf16 %v383_v3, %v383_v3  ;;  %v3315_v47 = vrot.slane %v538_v22, %v194_v50 }
 0x1a5   :  { %v3290_v48 = vpack.c.bf16 %v305_v36, %v303_v12  ;;  %v309_v51 = vadd.f32 %v308_v45, %v3266_v39  ;;  %499 = vst [vmem:[#allocation2 + $0x38] sm:$0xf] %v2081_v33  ;;  %v2083_v45 = vpack.c.bf16 %v375_v40, %v375_v40 }
 0x1a6   :  { %505 = vst [vmem:[#allocation2 + $0x5c] sm:$0xf] %v2087_v42 }
 0x1a7   :  { %v3293_v53 = vpack.c.bf16 %v309_v51, %v307_v44  ;;  %501 = vst [vmem:[#allocation2 + $0x44] sm:$0xf] %v2083_v45 }
 0x1a9   :  { %v312_v57 = vpop.f32.mrb[12].mxu0 }
 0x1aa   :  { %v313_v63 = vadd.f32 %v312_v57, %v3262_v38  ;;  %v314_v1 = vpop.f32.mrb[13].mxu0 }
 0x1ab   :  { %v315_v12 = vadd.f32 %v314_v1, %v3266_v39  ;;  %v316_v16 = vpop.f32.mrb[14].mxu0 }
 0x1ac   :  { %v317_v36 = vadd.f32 %v316_v16, %v3262_v38  ;;  %v318_v41 = vpop.f32.mrb[15].mxu0 }
 0x1ad   :  { %v3298_v43 = vpack.c.bf16 %v315_v12, %v313_v63  ;;  %v319_v44 = vadd.f32 %v318_v41, %v3266_v39  ;;  %v3318_v41 = vld [vmem:[#allocation2 + $0x8] ss:$12 sps:$4 sm:$0xff]  }
 0x1af   :  { %v2086_v51 = vpack.c.bf16 %v319_v44, %v317_v36  ;;  %v543_v44 = vunpack.c.l.bf16 %v3318_v41 }
 0x1b1   :  { %504 = vst [vmem:[#allocation2 + $0x54] sm:$0xff] %v2086_v51  ;;  %v722_v38 = vpop.f32.mrb[16].mxu0 }
 0x1b2   :  { %v723_v54 = vadd.f32 %v722_v38, %v3303_v46  ;;  %v724_v39 = vpop.f32.mrb[17].mxu0 }
 0x1b3   :  { %v725_v56 = vadd.f32 %v724_v39, %v3307_v58  ;;  %v726_v35 = vpop.f32.mrb[18].mxu0 }
 0x1b4   :  { %v769_v57 = vadd.f32 %v723_v54, %v541_v52  ;;  %v727_v60 = vpop.f32.mrb[19].mxu0  ;;  %v794_v35 = vunpack.c.l.bf16 %v3274_v49 }
 0x1b5   :  { %v776_v62 = vadd.f32 %v725_v56, %v542_v55 }
 0x1b6   :  { %v2037_v63 = vmul.f32 -1.442695, %v769_v57 }
 0x1b7   :  { %v2038_v37 = vmul.f32 -1.442695, %v776_v62  ;;  %v763_v1 = vpop.f32.mrb[8].mxu1 }
 0x1b8   :  { %2505 = vpow2.f32 %v2037_v63  ;;  %v2240_v2 = vpop.f32.mrb[9].mxu1  ;;  %v764_v36 = vadd.f32 %v763_v1, %v3315_v47  ;;  %v795_v63 = vunpack.c.h.bf16 %v3274_v49 }
 0x1b9   :  { %2507 = vpow2.f32 %v2038_v37  ;;  %v766_v3 = vpop.f32.mrb[10].mxu1 }
 0x1ba   :  { %v2241_v12 = vpop.f32.mrb[11].mxu1 }
 0x1c2   :  { %v2506_v9 = vpop.eup %2505 }
 0x1c3   :  { %v773_v16 = vadd.f32 1.0, %v2506_v9  ;;  %v2508_v33 = vpop.eup %2507 }
 0x1c4   :  { %v780_v40 = vadd.f32 1.0, %v2508_v33 }
 0x1c5   :  { %2509 = vrcp.f32 %v773_v16 }
 0x1c6   :  { %2511 = vrcp.f32 %v780_v40 }
 0x1cf   :  { %v2510_v42 = vpop.eup %2509 }
 0x1d0   :  { %v783_v45 = vmul.f32 %v2510_v42, %v764_v36  ;;  %v2512_v38 = vpop.eup %2511 }
 0x1d1   :  { %v786_v52 = vsub.f32 1.0, %v2512_v38  ;;  %v788_v34 = vmul.f32 0.0, %v2512_v38  ;;  %v796_v38 = vunpack.c.h.bf16 %v3318_v41 }
 0x1d2   :  { %v784_v51 = vadd.f32 %v783_v45, %v543_v44 }
 0x1d4   :  { %2513 = vtanh.f32 %v784_v51 }
 0x1de   :  { %v2514_v54 = vpop.eup %2513 }
 0x1df   :  { %v787_v39 = vmul.f32 %v2514_v54, %v786_v52 }
 0x1e1   :  { %v3321_v50 = vadd.f32 %v788_v34, %v787_v39 }
 0x1e3   :  { %v797_v22 = vpack.c.bf16 %v3321_v50, %v3321_v50 }
 0x1e5   :  { %831 = vmatmul.mubr.bf16.vlgmr.msra.gmra.mrb[20].mxu0 %v797_v22  ;;  %2259 = vmatmul.mubr.bf16.vlgmr.msra.gmra.mrb[12].mxu1 %v797_v22 }
 0x1e6   :  { %910 = vmatpush1.bf16.msra.mxu0 %v3125_v5  ;;  %2263 = vmatpush3.bf16.msra.mxu1 %v3153_v15 }
 0x1e7   :  { %911 = vmatprep.subr.bf16.mxu0 %v3127_v6  ;;  %2264 = vmatprep.subr.bf16.mxu1 %v2904_v17 }
 0x1e8   :  { %941 = vmatprep.mubr.bf16.mxu0 %v2903_v0  ;;  %2278 = vmatprep.mubr.msk.bf16.mxu1 %vm2905_vm1, %v2904_v17 }
 0x1ea   :  { %912 = vmatpush1.bf16.msra.mxu0 %v3133_v7  ;;  %2265 = vmatpush3.bf16.msra.mxu1 %v3164_v20 }
 0x1eb   :  { %913 = vmatprep.subr.bf16.mxu0 %v3137_v8  ;;  %2266 = vmatprep.subr.bf16.mxu1 %v2904_v17 }
 0x1ee   :  { %914 = vmatpush1.bf16.msra.mxu0 %v3140_v10  ;;  %2267 = vmatpush3.bf16.msra.mxu1 %v3179_v25 }
 0x1ef   :  { %915 = vmatprep.subr.bf16.mxu0 %v3143_v11  ;;  %2268 = vmatprep.subr.bf16.mxu1 %v2904_v17 }
 0x1f2   :  { %916 = vmatpush1.bf16.msra.mxu0 %v3147_v13  ;;  %2269 = vmatpush3.bf16.msra.mxu1 %v3185_v27 }
 0x1f3   :  { %917 = vmatprep.subr.bf16.mxu0 %v3151_v14  ;;  %2270 = vmatprep.subr.bf16.mxu1 %v2904_v17 }
 0x1f6   :  { %918 = vmatpush1.bf16.msra.mxu0 %v3157_v18  ;;  %2271 = vmatpush3.bf16.msra.mxu1 %v3198_v29 }
 0x1f7   :  { %919 = vmatprep.subr.bf16.mxu0 %v3160_v19  ;;  %2272 = vmatprep.subr.bf16.mxu1 %v2904_v17 }
 0x1fa   :  { %920 = vmatpush1.bf16.msra.mxu0 %v3170_v21  ;;  %2273 = vmatpush3.bf16.msra.mxu1 %v3206_v30 }
 0x1fb   :  { %921 = vmatprep.subr.bf16.mxu0 %v3174_v23  ;;  %2274 = vmatprep.subr.bf16.mxu1 %v2904_v17 }
 0x1fe   :  { %922 = vmatpush1.bf16.msra.mxu0 %v3176_v24  ;;  %2275 = vmatpush3.bf16.msra.mxu1 %v3214_v31 }
 0x1ff   :  { %923 = vmatprep.subr.bf16.mxu0 %v3181_v26  ;;  %2276 = vmatprep.subr.bf16.mxu1 %v2904_v17 }
 0x202   :  { %924 = vmatpush1.bf16.msra.mxu0 %v3189_v28  ;;  %2277 = vmatpush3.bf16.msra.mxu1 %v3220_v32 }
 0x203   :  { %1020 = vmatprep.subr.bf16.mxu0 %v3123_v4  ;;  %2282 = vmatprep.subr.bf16.mxu1 %v2904_v17 }
 0x2b8   :  { %v832_v55 = vpop.f32.mrb[20].mxu0  ;;  %v873_v56 = vpop.f32.mrb[12].mxu1 }
 0x2b9   :  { %v833_v57 = vadd.f32 %v832_v55, %v3303_v46  ;;  %v834_v60 = vpop.f32.mrb[21].mxu0  ;;  %v2260_v62 = vpop.f32.mrb[13].mxu1  ;;  %v874_v51 = vadd.f32 %v873_v56, %v3315_v47 }
 0x2ba   :  { %v835_v37 = vadd.f32 %v834_v60, %v3307_v58  ;;  %v836_v1 = vpop.f32.mrb[22].mxu0  ;;  %v876_v2 = vpop.f32.mrb[14].mxu1  ;;  %v905_v62 = vunpack.c.l.bf16 %v3282_v59 }
 0x2bb   :  { %v879_v3 = vadd.f32 %v833_v57, %v794_v35  ;;  %v837_v9 = vpop.f32.mrb[23].mxu0  ;;  %v2261_v12 = vpop.f32.mrb[15].mxu1  ;;  %v906_v2 = vunpack.c.h.bf16 %v3282_v59 }
 0x2bc   :  { %v886_v16 = vadd.f32 %v835_v37, %v795_v63 }
 0x2bd   :  { %v2039_v33 = vmul.f32 -1.442695, %v879_v3 }
 0x2be   :  { %v2040_v40 = vmul.f32 -1.442695, %v886_v16 }
 0x2bf   :  { %2515 = vpow2.f32 %v2039_v33 }
 0x2c0   :  { %2517 = vpow2.f32 %v2040_v40 }
 0x2c9   :  { %v2516_v36 = vpop.eup %2515 }
 0x2ca   :  { %v883_v42 = vadd.f32 1.0, %v2516_v36  ;;  %v2518_v44 = vpop.eup %2517 }
 0x2cb   :  { %v890_v45 = vadd.f32 1.0, %v2518_v44 }
 0x2cc   :  { %2519 = vrcp.f32 %v883_v42 }
 0x2cd   :  { %2521 = vrcp.f32 %v890_v45 }
 0x2d6   :  { %v2520_v49 = vpop.eup %2519 }
 0x2d7   :  { %v893_v52 = vmul.f32 %v2520_v49, %v874_v51  ;;  %v2522_v39 = vpop.eup %2521 }
 0x2d8   :  { %v896_v34 = vsub.f32 1.0, %v2522_v39  ;;  %v898_v35 = vmul.f32 %v2522_v39, %v3321_v50 }
 0x2d9   :  { %v894_v54 = vadd.f32 %v893_v52, %v796_v38  ;;  %v3410_v52 = vld [vmem:[#allocation2 + $0x20] ss:$12 sps:$4 sm:$0xff]  }
 0x2da   :  { %v907_v39 = vunpack.c.l.bf16 %v3410_v52 }
 0x2db   :  { %2523 = vtanh.f32 %v894_v54 }
 0x2e5   :  { %v2524_v22 = vpop.eup %2523 }
 0x2e6   :  { %v897_v55 = vmul.f32 %v2524_v22, %v896_v34 }
 0x2e8   :  { %v3367_v57 = vadd.f32 %v898_v35, %v897_v55 }
 0x2ea   :  { %v908_v60 = vpack.c.bf16 %v3367_v57, %v3367_v57 }
 0x2ec   :  { %942 = vmatmul.mubr.bf16.vlgmr.msra.gmra.mrb[24].mxu0 %v908_v60  ;;  %2279 = vmatmul.mubr.bf16.vlgmr.msra.gmra.mrb[16].mxu1 %v908_v60 }
 0x2ed   :  { %1021 = vmatpush1.bf16.msra.mxu0 %v3125_v5  ;;  %2283 = vmatpush3.bf16.msra.mxu1 %v3153_v15 }
 0x2ee   :  { %1022 = vmatprep.subr.bf16.mxu0 %v3127_v6  ;;  %2284 = vmatprep.subr.bf16.mxu1 %v2904_v17 }
 0x2ef   :  { %1052 = vmatprep.mubr.bf16.mxu0 %v2903_v0  ;;  %2298 = vmatprep.mubr.msk.bf16.mxu1 %vm2905_vm1, %v2904_v17 }
 0x2f1   :  { %1023 = vmatpush1.bf16.msra.mxu0 %v3133_v7  ;;  %2285 = vmatpush3.bf16.msra.mxu1 %v3164_v20 }
 0x2f2   :  { %1024 = vmatprep.subr.bf16.mxu0 %v3137_v8  ;;  %2286 = vmatprep.subr.bf16.mxu1 %v2904_v17 }
 0x2f5   :  { %1025 = vmatpush1.bf16.msra.mxu0 %v3140_v10  ;;  %2287 = vmatpush3.bf16.msra.mxu1 %v3179_v25 }
 0x2f6   :  { %1026 = vmatprep.subr.bf16.mxu0 %v3143_v11  ;;  %2288 = vmatprep.subr.bf16.mxu1 %v2904_v17 }
 0x2f9   :  { %1027 = vmatpush1.bf16.msra.mxu0 %v3147_v13  ;;  %2289 = vmatpush3.bf16.msra.mxu1 %v3185_v27 }
 0x2fa   :  { %1028 = vmatprep.subr.bf16.mxu0 %v3151_v14  ;;  %2290 = vmatprep.subr.bf16.mxu1 %v2904_v17 }
 0x2fd   :  { %1029 = vmatpush1.bf16.msra.mxu0 %v3157_v18  ;;  %2291 = vmatpush3.bf16.msra.mxu1 %v3198_v29 }
 0x2fe   :  { %1030 = vmatprep.subr.bf16.mxu0 %v3160_v19  ;;  %2292 = vmatprep.subr.bf16.mxu1 %v2904_v17 }
 0x301   :  { %1031 = vmatpush1.bf16.msra.mxu0 %v3170_v21  ;;  %2293 = vmatpush3.bf16.msra.mxu1 %v3206_v30 }
 0x302   :  { %1032 = vmatprep.subr.bf16.mxu0 %v3174_v23  ;;  %2294 = vmatprep.subr.bf16.mxu1 %v2904_v17 }
 0x305   :  { %1033 = vmatpush1.bf16.msra.mxu0 %v3176_v24  ;;  %2295 = vmatpush3.bf16.msra.mxu1 %v3214_v31 }
 0x306   :  { %1034 = vmatprep.subr.bf16.mxu0 %v3181_v26  ;;  %2296 = vmatprep.subr.bf16.mxu1 %v2904_v17 }
 0x309   :  { %1035 = vmatpush1.bf16.msra.mxu0 %v3189_v28  ;;  %2297 = vmatpush3.bf16.msra.mxu1 %v3220_v32 }
 0x30a   :  { %1131 = vmatprep.subr.bf16.mxu0 %v3123_v4  ;;  %2302 = vmatprep.subr.bf16.mxu1 %v2904_v17 }
 0x3bf   :  { %v943_v41 = vpop.f32.mrb[24].mxu0  ;;  %v984_v56 = vpop.f32.mrb[16].mxu1 }
 0x3c0   :  { %v944_v63 = vadd.f32 %v943_v41, %v3303_v46  ;;  %v945_v37 = vpop.f32.mrb[25].mxu0  ;;  %v2280_v1 = vpop.f32.mrb[17].mxu1  ;;  %v985_v59 = vadd.f32 %v984_v56, %v3315_v47 }
 0x3c1   :  { %v946_v3 = vadd.f32 %v945_v37, %v3307_v58  ;;  %v947_v9 = vpop.f32.mrb[26].mxu0  ;;  %v987_v12 = vpop.f32.mrb[18].mxu1 }
 0x3c2   :  { %v990_v16 = vadd.f32 %v944_v63, %v905_v62  ;;  %v948_v33 = vpop.f32.mrb[27].mxu0  ;;  %v2281_v40 = vpop.f32.mrb[19].mxu1 }
 0x3c3   :  { %v997_v36 = vadd.f32 %v946_v3, %v906_v2 }
 0x3c4   :  { %v2041_v42 = vmul.f32 -1.442695, %v990_v16 }
 0x3c5   :  { %v2042_v44 = vmul.f32 -1.442695, %v997_v36 }
 0x3c6   :  { %2525 = vpow2.f32 %v2041_v42 }
 0x3c7   :  { %2527 = vpow2.f32 %v2042_v44 }
 0x3d0   :  { %v2526_v45 = vpop.eup %2525 }
 0x3d1   :  { %v994_v51 = vadd.f32 1.0, %v2526_v45  ;;  %v2528_v49 = vpop.eup %2527 }
 0x3d2   :  { %v1001_v38 = vadd.f32 1.0, %v2528_v49 }
 0x3d3   :  { %2529 = vrcp.f32 %v994_v51  ;;  %v1018_v51 = vunpack.c.h.bf16 %v3410_v52  ;;  %v3469_v52 = vld [vmem:[#allocation10 + $0x1c] ss:$12 sps:$4 sm:$0xff]  }
 0x3d4   :  { %2531 = vrcp.f32 %v1001_v38 }
 0x3dd   :  { %v2530_v54 = vpop.eup %2529 }
 0x3de   :  { %v1004_v34 = vmul.f32 %v2530_v54, %v985_v59  ;;  %v2532_v55 = vpop.eup %2531 }
 0x3df   :  { %v1007_v35 = vsub.f32 1.0, %v2532_v55  ;;  %v1009_v62 = vmul.f32 %v2532_v55, %v3367_v57 }
 0x3e0   :  { %v1005_v22 = vadd.f32 %v1004_v34, %v907_v39 }
 0x3e2   :  { %2533 = vtanh.f32 %v1005_v22 }
 0x3ec   :  { %v2534_v60 = vpop.eup %2533 }
 0x3ed   :  { %v1008_v41 = vmul.f32 %v2534_v60, %v1007_v35  ;;  %v3465_v60 = vld [vmem:[#allocation10] ss:$12 sps:$4 sm:$0xff]  }
 0x3ef   :  { %v3415_v63 = vadd.f32 %v1009_v62, %v1008_v41  ;;  %v3476_v41 = vld [vmem:[#allocation10 + $0x18] ss:$12 sps:$4 sm:$0xff]   ;;  %v3480_v62 = vld [vmem:[#allocation10 + $0x34] ss:$12 sps:$4 sm:$0xff]  }
 0x3f1   :  { %v1019_v37 = vpack.c.bf16 %v3415_v63, %v3415_v63 }
 0x3f3   :  { %1053 = vmatmul.mubr.bf16.vlgmr.msra.gmra.mrb[28].mxu0 %v1019_v37  ;;  %2299 = vmatmul.mubr.bf16.vlgmr.msra.gmra.mrb[20].mxu1 %v1019_v37  ;;  %v3488_v37 = vld [vmem:[#allocation10 + $0x4c] ss:$12 sps:$4 sm:$0xff]  }
 0x3f4   :  { %1132 = vmatpush1.bf16.msra.mxu0 %v3125_v5  ;;  %2303 = vmatpush3.bf16.msra.mxu1 %v3153_v15 }
 0x3f5   :  { %1133 = vmatprep.subr.bf16.mxu0 %v3127_v6  ;;  %2304 = vmatprep.subr.bf16.mxu1 %v2904_v17 }
 0x3f6   :  { %1163 = vmatprep.mubr.bf16.mxu0 %v2903_v0  ;;  %2318 = vmatprep.mubr.msk.bf16.mxu1 %vm2905_vm1, %v2904_v17 }
 0x3f8   :  { %1134 = vmatpush1.bf16.msra.mxu0 %v3133_v7  ;;  %2305 = vmatpush3.bf16.msra.mxu1 %v3164_v20  ;;  %v1016_v7 = vunpack.c.l.bf16 %v3285_v61 }
 0x3f9   :  { %1135 = vmatprep.subr.bf16.mxu0 %v3137_v8  ;;  %2306 = vmatprep.subr.bf16.mxu1 %v2904_v17 }
 0x3fc   :  { %1136 = vmatpush1.bf16.msra.mxu0 %v3140_v10  ;;  %2307 = vmatpush3.bf16.msra.mxu1 %v3179_v25 }
 0x3fd   :  { %1137 = vmatprep.subr.bf16.mxu0 %v3143_v11  ;;  %2308 = vmatprep.subr.bf16.mxu1 %v2904_v17 }
 0x400   :  { %1138 = vmatpush1.bf16.msra.mxu0 %v3147_v13  ;;  %2309 = vmatpush3.bf16.msra.mxu1 %v3185_v27  ;;  %v1017_v13 = vunpack.c.h.bf16 %v3285_v61 }
 0x401   :  { %1139 = vmatprep.subr.bf16.mxu0 %v3151_v14  ;;  %2310 = vmatprep.subr.bf16.mxu1 %v2904_v17 }
 0x404   :  { %1140 = vmatpush1.bf16.msra.mxu0 %v3157_v18  ;;  %2311 = vmatpush3.bf16.msra.mxu1 %v3198_v29 }
 0x405   :  { %1141 = vmatprep.subr.bf16.mxu0 %v3160_v19  ;;  %2312 = vmatprep.subr.bf16.mxu1 %v2904_v17 }
 0x408   :  { %1142 = vmatpush1.bf16.msra.mxu0 %v3170_v21  ;;  %2313 = vmatpush3.bf16.msra.mxu1 %v3206_v30 }
 0x409   :  { %1143 = vmatprep.subr.bf16.mxu0 %v3174_v23  ;;  %2314 = vmatprep.subr.bf16.mxu1 %v2904_v17 }
 0x40c   :  { %1144 = vmatpush1.bf16.msra.mxu0 %v3176_v24  ;;  %2315 = vmatpush3.bf16.msra.mxu1 %v3214_v31 }
 0x40d   :  { %1145 = vmatprep.subr.bf16.mxu0 %v3181_v26  ;;  %2316 = vmatprep.subr.bf16.mxu1 %v2904_v17 }
 0x410   :  { %1146 = vmatpush1.bf16.msra.mxu0 %v3189_v28  ;;  %2317 = vmatpush3.bf16.msra.mxu1 %v3220_v32 }
 0x411   :  { %1242 = vmatprep.subr.bf16.mxu0 %v3123_v4  ;;  %2322 = vmatprep.subr.bf16.mxu1 %v2904_v17 }
 0x4c6   :  { %v1054_v5 = vpop.f32.mrb[28].mxu0  ;;  %v1095_v6 = vpop.f32.mrb[20].mxu1 }
 0x4c7   :  { %v1055_v8 = vadd.f32 %v1054_v5, %v3303_v46  ;;  %v1056_v10 = vpop.f32.mrb[29].mxu0  ;;  %v2300_v11 = vpop.f32.mrb[21].mxu1  ;;  %v1096_v45 = vadd.f32 %v1095_v6, %v3315_v47  ;;  %v3492_v5 = vld [vmem:[#allocation10 + $0x48] ss:$12 sps:$4 sm:$0xff]  }
 0x4c8   :  { %v1057_v56 = vadd.f32 %v1056_v10, %v3307_v58  ;;  %v1058_v1 = vpop.f32.mrb[30].mxu0  ;;  %v1098_v2 = vpop.f32.mrb[22].mxu1 }
 0x4c9   :  { %v1101_v3 = vadd.f32 %v1055_v8, %v1016_v7  ;;  %v1059_v9 = vpop.f32.mrb[31].mxu0  ;;  %v2301_v12 = vpop.f32.mrb[23].mxu1 }
 0x4ca   :  { %v1108_v4 = vadd.f32 %v1057_v56, %v1017_v13 }
 0x4cb   :  { %v2043_v16 = vmul.f32 -1.442695, %v1101_v3  ;;  %v3520_v3 = vld [vmem:[#allocation2 + $0x38] ss:$12 sps:$4 sm:$0xff]  }
 0x4cc   :  { %v2044_v33 = vmul.f32 -1.442695, %v1108_v4  ;;  %v1129_v12 = vunpack.c.l.bf16 %v3520_v3 }
 0x4cd   :  { %2535 = vpow2.f32 %v2043_v16 }
 0x4ce   :  { %2537 = vpow2.f32 %v2044_v33 }
 0x4d7   :  { %v2536_v40 = vpop.eup %2535 }
 0x4d8   :  { %v1105_v36 = vadd.f32 1.0, %v2536_v40  ;;  %v2538_v42 = vpop.eup %2537 }
 0x4d9   :  { %v1112_v44 = vadd.f32 1.0, %v2538_v42 }
 0x4da   :  { %2539 = vrcp.f32 %v1105_v36 }
 0x4db   :  { %2541 = vrcp.f32 %v1112_v44 }
 0x4e4   :  { %v2540_v61 = vpop.eup %2539 }
 0x4e5   :  { %v1115_v49 = vmul.f32 %v2540_v61, %v1096_v45  ;;  %v2542_v59 = vpop.eup %2541 }
 0x4e6   :  { %v1118_v54 = vsub.f32 1.0, %v2542_v59  ;;  %v1120_v22 = vmul.f32 %v2542_v59, %v3415_v63  ;;  %v3551_v59 = vld [vmem:[#allocation10 + $0x50] ss:$12 sps:$4 sm:$0xff]  }
 0x4e7   :  { %v1116_v38 = vadd.f32 %v1115_v49, %v1018_v51  ;;  %v3530_v51 = vld [vmem:[#allocation10 + $0x8] ss:$12 sps:$4 sm:$0xff]   ;;  %v3539_v49 = vld [vmem:[#allocation10 + $0x20] ss:$12 sps:$4 sm:$0xff]  }
 0x4e9   :  { %2543 = vtanh.f32 %v1116_v38  ;;  %v3545_v38 = vld [vmem:[#allocation10 + $0x38] ss:$12 sps:$4 sm:$0xff]  }
 0x4f3   :  { %v2544_v39 = vpop.eup %2543 }
 0x4f4   :  { %v1119_v34 = vmul.f32 %v2544_v39, %v1118_v54  ;;  %v3554_v54 = vld [vmem:[#allocation10 + $0x64] ss:$12 sps:$4 sm:$0xff]   ;;  %v3558_v39 = vld [vmem:[#allocation10 + $0x60] ss:$12 sps:$4 sm:$0xff]  }
 0x4f6   :  { %v3461_v55 = vadd.f32 %v1120_v22, %v1119_v34  ;;  %v3561_v34 = vld [vmem:[#allocation10 + $0x68] ss:$12 sps:$4 sm:$0xff]  }
 0x4f7   :  { %v3564_v22 = vld [vmem:[#allocation10 + $0x7c] ss:$12 sps:$4 sm:$0xff]  }
 0x4f8   :  { %v1130_v35 = vpack.c.bf16 %v3461_v55, %v3461_v55 }
 0x4fa   :  { %1164 = vmatmul.mubr.bf16.vlgmr.msra.gmra.mrb[32].mxu0 %v1130_v35  ;;  %2319 = vmatmul.mubr.bf16.vlgmr.msra.gmra.mrb[24].mxu1 %v1130_v35  ;;  %v3568_v35 = vld [vmem:[#allocation10 + $0x78] ss:$12 sps:$4 sm:$0xff]  }
 0x4fb   :  { %1243 = vmatpush1.bf16.msra.mxu0 %v3465_v60  ;;  %2323 = vmatpush3.bf16.msra.mxu1 %v3153_v15  ;;  %v3484_v15 = vld [vmem:[#allocation10 + $0x30] ss:$12 sps:$4 sm:$0xff]  }
 0x4fc   :  { %1244 = vmatprep.subr.bf16.mxu0 %v3469_v52  ;;  %2324 = vmatprep.subr.bf16.mxu1 %v2904_v17 }
 0x4fd   :  { %1274 = vmatprep.mubr.bf16.mxu0 %v2903_v0  ;;  %2338 = vmatprep.mubr.msk.bf16.mxu1 %vm2905_vm1, %v2904_v17 }
 0x4ff   :  { %1245 = vmatpush1.bf16.msra.mxu0 %v3476_v41  ;;  %2325 = vmatpush3.bf16.msra.mxu1 %v3164_v20  ;;  %v1127_v20 = vunpack.c.l.bf16 %v3290_v48 }
 0x500   :  { %1246 = vmatprep.subr.bf16.mxu0 %v3480_v62  ;;  %2326 = vmatprep.subr.bf16.mxu1 %v2904_v17 }
 0x503   :  { %1247 = vmatpush1.bf16.msra.mxu0 %v3484_v15  ;;  %2327 = vmatpush3.bf16.msra.mxu1 %v3179_v25  ;;  %v1128_v25 = vunpack.c.h.bf16 %v3290_v48 }
 0x504   :  { %1248 = vmatprep.subr.bf16.mxu0 %v3488_v37  ;;  %2328 = vmatprep.subr.bf16.mxu1 %v2904_v17 }
 0x507   :  { %1249 = vmatpush1.bf16.msra.mxu0 %v3492_v5  ;;  %2329 = vmatpush3.bf16.msra.mxu1 %v3185_v27 }
 0x508   :  { %1250 = vmatprep.subr.bf16.mxu0 %v3151_v14  ;;  %2330 = vmatprep.subr.bf16.mxu1 %v2904_v17  ;;  %v3512_v14 = vld [vmem:[#allocation10 + $0x4] ss:$12 sps:$4 sm:$0xff]  }
 0x50b   :  { %1251 = vmatpush1.bf16.msra.mxu0 %v3157_v18  ;;  %2331 = vmatpush3.bf16.msra.mxu1 %v3198_v29 }
 0x50c   :  { %1252 = vmatprep.subr.bf16.mxu0 %v3160_v19  ;;  %2332 = vmatprep.subr.bf16.mxu1 %v2904_v17 }
 0x50f   :  { %1253 = vmatpush1.bf16.msra.mxu0 %v3170_v21  ;;  %2333 = vmatpush3.bf16.msra.mxu1 %v3206_v30 }
 0x510   :  { %1254 = vmatprep.subr.bf16.mxu0 %v3174_v23  ;;  %2334 = vmatprep.subr.bf16.mxu1 %v2904_v17 }
 0x513   :  { %1255 = vmatpush1.bf16.msra.mxu0 %v3176_v24  ;;  %2335 = vmatpush3.bf16.msra.mxu1 %v3214_v31 }
 0x514   :  { %1256 = vmatprep.subr.bf16.mxu0 %v3181_v26  ;;  %2336 = vmatprep.subr.bf16.mxu1 %v2904_v17 }
 0x517   :  { %1257 = vmatpush1.bf16.msra.mxu0 %v3189_v28  ;;  %2337 = vmatpush3.bf16.msra.mxu1 %v3220_v32 }
 0x518   :  { %1353 = vmatprep.subr.bf16.mxu0 %v3512_v14  ;;  %2342 = vmatprep.subr.bf16.mxu1 %v2904_v17 }
 0x5cd   :  { %v1165_v18 = vpop.f32.mrb[32].mxu0  ;;  %v1206_v19 = vpop.f32.mrb[24].mxu1 }
 0x5ce   :  { %v1166_v21 = vadd.f32 %v1165_v18, %v3303_v46  ;;  %v1167_v23 = vpop.f32.mrb[33].mxu0  ;;  %v2320_v24 = vpop.f32.mrb[25].mxu1  ;;  %v1207_v48 = vadd.f32 %v1206_v19, %v3315_v47  ;;  %v3572_v18 = vld [vmem:[#allocation10 + $0x94] ss:$12 sps:$4 sm:$0xff]   ;;  %v3576_v19 = vld [vmem:[#allocation10 + $0x90] ss:$12 sps:$4 sm:$0xff]  }
 0x5cf   :  { %v1168_v26 = vadd.f32 %v1167_v23, %v3307_v58  ;;  %v1169_v27 = vpop.f32.mrb[34].mxu0  ;;  %v1209_v28 = vpop.f32.mrb[26].mxu1 }
 0x5d0   :  { %v1212_v29 = vadd.f32 %v1166_v21, %v1127_v20  ;;  %v1170_v6 = vpop.f32.mrb[35].mxu0  ;;  %v2321_v7 = vpop.f32.mrb[27].mxu1  ;;  %v3580_v20 = vld [vmem:[#allocation10 + $0xac] ss:$12 sps:$4 sm:$0xff]   ;;  %v3584_v21 = vld [vmem:[#allocation10 + $0xa8] ss:$12 sps:$4 sm:$0xff]   ;;  %v1239_v27 = vunpack.c.h.bf16 %v3293_v53 }
 0x5d1   :  { %v1219_v8 = vadd.f32 %v1168_v26, %v1128_v25 }
 0x5d2   :  { %v2045_v10 = vmul.f32 -1.442695, %v1212_v29 }
 0x5d3   :  { %v2046_v11 = vmul.f32 -1.442695, %v1219_v8 }
 0x5d4   :  { %2545 = vpow2.f32 %v2045_v10 }
 0x5d5   :  { %2547 = vpow2.f32 %v2046_v11 }
 0x5de   :  { %v2546_v13 = vpop.eup %2545 }
 0x5df   :  { %v1216_v56 = vadd.f32 1.0, %v2546_v13  ;;  %v2548_v1 = vpop.eup %2547 }
 0x5e0   :  { %v1223_v2 = vadd.f32 1.0, %v2548_v1 }
 0x5e1   :  { %2549 = vrcp.f32 %v1216_v56 }
 0x5e2   :  { %2551 = vrcp.f32 %v1223_v2 }
 0x5eb   :  { %v2550_v9 = vpop.eup %2549 }
 0x5ec   :  { %v1226_v4 = vmul.f32 %v2550_v9, %v1207_v48  ;;  %v2552_v33 = vpop.eup %2551  ;;  %v1240_v9 = vunpack.c.h.bf16 %v3520_v3 }
 0x5ed   :  { %v1229_v40 = vsub.f32 1.0, %v2552_v33  ;;  %v1231_v44 = vmul.f32 %v2552_v33, %v3461_v55 }
 0x5ee   :  { %v1227_v16 = vadd.f32 %v1226_v4, %v1129_v12 }
 0x5f0   :  { %2553 = vtanh.f32 %v1227_v16 }
 0x5fa   :  { %v2554_v36 = vpop.eup %2553 }
 0x5fb   :  { %v1230_v42 = vmul.f32 %v2554_v36, %v1229_v40 }
 0x5fd   :  { %v3525_v45 = vadd.f32 %v1231_v44, %v1230_v42 }
 0x5ff   :  { %v1241_v61 = vpack.c.bf16 %v3525_v45, %v3525_v45 }
 0x601   :  { %1275 = vmatmul.mubr.bf16.vlgmr.msra.gmra.mrb[36].mxu0 %v1241_v61  ;;  %2339 = vmatmul.mubr.bf16.vlgmr.msra.gmra.mrb[28].mxu1 %v1241_v61 }
 0x602   :  { %1354 = vmatpush1.bf16.msra.mxu0 %v3465_v60  ;;  %2343 = vmatpush3.bf16.msra.mxu1 %v3530_v51 }
 0x603   :  { %1355 = vmatprep.subr.bf16.mxu0 %v3469_v52  ;;  %2344 = vmatprep.subr.bf16.mxu1 %v2904_v17 }
 0x604   :  { %1385 = vmatprep.mubr.bf16.mxu0 %v2903_v0  ;;  %2358 = vmatprep.mubr.msk.bf16.mxu1 %vm2905_vm1, %v2904_v17 }
 0x606   :  { %1356 = vmatpush1.bf16.msra.mxu0 %v3476_v41  ;;  %2345 = vmatpush3.bf16.msra.mxu1 %v3539_v49 }
 0x607   :  { %1357 = vmatprep.subr.bf16.mxu0 %v3480_v62  ;;  %2346 = vmatprep.subr.bf16.mxu1 %v2904_v17 }
 0x60a   :  { %1358 = vmatpush1.bf16.msra.mxu0 %v3484_v15  ;;  %2347 = vmatpush3.bf16.msra.mxu1 %v3545_v38 }
 0x60b   :  { %1359 = vmatprep.subr.bf16.mxu0 %v3488_v37  ;;  %2348 = vmatprep.subr.bf16.mxu1 %v2904_v17 }
 0x60e   :  { %1360 = vmatpush1.bf16.msra.mxu0 %v3492_v5  ;;  %2349 = vmatpush3.bf16.msra.mxu1 %v3551_v59 }
 0x60f   :  { %1361 = vmatprep.subr.bf16.mxu0 %v3554_v54  ;;  %2350 = vmatprep.subr.bf16.mxu1 %v2904_v17 }
 0x612   :  { %1362 = vmatpush1.bf16.msra.mxu0 %v3558_v39  ;;  %2351 = vmatpush3.bf16.msra.mxu1 %v3561_v34 }
 0x613   :  { %1363 = vmatprep.subr.bf16.mxu0 %v3564_v22  ;;  %2352 = vmatprep.subr.bf16.mxu1 %v2904_v17 }
 0x616   :  { %1364 = vmatpush1.bf16.msra.mxu0 %v3568_v35  ;;  %2353 = vmatpush3.bf16.msra.mxu1 %v3206_v30 }
 0x617   :  { %1365 = vmatprep.subr.bf16.mxu0 %v3572_v18  ;;  %2354 = vmatprep.subr.bf16.mxu1 %v2904_v17 }
 0x61a   :  { %1366 = vmatpush1.bf16.msra.mxu0 %v3576_v19  ;;  %2355 = vmatpush3.bf16.msra.mxu1 %v3214_v31  ;;  %v1238_v31 = vunpack.c.l.bf16 %v3293_v53 }
 0x61b   :  { %1367 = vmatprep.subr.bf16.mxu0 %v3580_v20  ;;  %2356 = vmatprep.subr.bf16.mxu1 %v2904_v17 }
 0x61e   :  { %1368 = vmatpush1.bf16.msra.mxu0 %v3584_v21  ;;  %2357 = vmatpush3.bf16.msra.mxu1 %v3220_v32 }
 0x61f   :  { %1464 = vmatprep.subr.bf16.mxu0 %v3512_v14  ;;  %2362 = vmatprep.subr.bf16.mxu1 %v2904_v17 }
 0x6d4   :  { %v1276_v30 = vpop.f32.mrb[36].mxu0  ;;  %v1317_v23 = vpop.f32.mrb[28].mxu1 }
 0x6d5   :  { %v1277_v24 = vadd.f32 %v1276_v30, %v3303_v46  ;;  %v1278_v25 = vpop.f32.mrb[37].mxu0  ;;  %v2340_v26 = vpop.f32.mrb[29].mxu1  ;;  %v1318_v48 = vadd.f32 %v1317_v23, %v3315_v47  ;;  %v3635_v23 = vld [vmem:[#allocation2 + $0x50] ss:$12 sps:$4 sm:$0xff]  }
 0x6d6   :  { %v1279_v28 = vadd.f32 %v1278_v25, %v3307_v58  ;;  %v1280_v29 = vpop.f32.mrb[38].mxu0  ;;  %v1320_v6 = vpop.f32.mrb[30].mxu1 }
 0x6d7   :  { %v1323_v7 = vadd.f32 %v1277_v24, %v1238_v31  ;;  %v1281_v32 = vpop.f32.mrb[39].mxu0  ;;  %v2341_v8 = vpop.f32.mrb[31].mxu1  ;;  %v1351_v24 = vunpack.c.l.bf16 %v3635_v23 }
 0x6d8   :  { %v1330_v14 = vadd.f32 %v1279_v28, %v1239_v27 }
 0x6d9   :  { %v2047_v10 = vmul.f32 -1.442695, %v1323_v7 }
 0x6da   :  { %v2048_v11 = vmul.f32 -1.442695, %v1330_v14  ;;  %v2490_v14 = vld [vmem:[#allocation14 + $0x8] sm:$0xff]  }
 0x6db   :  { %2555 = vpow2.f32 %v2047_v10  ;;  %v1576_v10 = vpack.c.bf16 %v3367_v57, %v3321_v50 }
 0x6dc   :  { %2557 = vpow2.f32 %v2048_v11  ;;  %v2491_v11 = vld [vmem:[#allocation14 + $0x10] sm:$0xff]  }
 0x6e5   :  { %v2556_v13 = vpop.eup %2555 }
 0x6e6   :  { %v1327_v56 = vadd.f32 1.0, %v2556_v13  ;;  %v2558_v1 = vpop.eup %2557  ;;  %v2492_v13 = vld [vmem:[#allocation14 + $0x18] sm:$0xff]  }
 0x6e7   :  { %v1334_v2 = vadd.f32 1.0, %v2558_v1  ;;  %v2494_v1 = vld [vmem:[#allocation14 + $0x28] sm:$0xff]  }
 0x6e8   :  { %2559 = vrcp.f32 %v1327_v56  ;;  %v2493_v56 = vld [vmem:[#allocation14 + $0x20] sm:$0xff]  }
 0x6e9   :  { %2561 = vrcp.f32 %v1334_v2  ;;  %v2495_v2 = vld [vmem:[#allocation14 + $0x30] sm:$0xff]  }
 0x6f2   :  { %v2560_v53 = vpop.eup %2559 }
 0x6f3   :  { %v1337_v12 = vmul.f32 %v2560_v53, %v1318_v48  ;;  %v2562_v16 = vpop.eup %2561  ;;  %v2496_v48 = vld [vmem:[#allocation14 + $0x38] sm:$0xff]   ;;  %v1577_v53 = vpack.c.bf16 %v3461_v55, %v3415_v63 }
 0x6f4   :  { %v1340_v33 = vsub.f32 1.0, %v2562_v16  ;;  %v1342_v42 = vmul.f32 %v2562_v16, %v3525_v45  ;;  %v2499_v16 = vld [vmem:[#allocation17 + $0x10] sm:$0xff]  }
 0x6f5   :  { %v1338_v4 = vadd.f32 %v1337_v12, %v1240_v9  ;;  %v2497_v12 = vld [vmem:[#allocation17] sm:$0xff]  }
 0x6f7   :  { %2563 = vtanh.f32 %v1338_v4  ;;  %v2498_v4 = vld [vmem:[#allocation17 + $0x8] sm:$0xff]  }
 0x701   :  { %v2564_v40 = vpop.eup %2563 }
 0x702   :  { %v1341_v36 = vmul.f32 %v2564_v40, %v1340_v33  ;;  %v2500_v33 = vld [vmem:[#allocation17 + $0x18] sm:$0xff]   ;;  %v2501_v40 = vld [vmem:[#allocation17 + $0x20] sm:$0xff]  }
 0x704   :  { %v3597_v44 = vadd.f32 %v1342_v42, %v1341_v36  ;;  %v2502_v36 = vld [vmem:[#allocation17 + $0x28] sm:$0xff]   ;;  %v2503_v42 = vld [vmem:[#allocation17 + $0x30] sm:$0xff]  }
 0x706   :  { %v1352_v61 = vpack.c.bf16 %v3597_v44, %v3597_v44  ;;  %v1578_v9 = vpack.c.bf16 %v3597_v44, %v3525_v45 }
 0x708   :  { %1386 = vmatmul.mubr.bf16.vlgmr.msra.gmra.mrb[40].mxu0 %v1352_v61  ;;  %2359 = vmatmul.mubr.bf16.vlgmr.msra.gmra.mrb[32].mxu1 %v1352_v61  ;;  %v2504_v61 = vld [vmem:[#allocation17 + $0x38] sm:$0xff]  }
 0x709   :  { %1465 = vmatpush1.bf16.msra.mxu0 %v3465_v60  ;;  %2363 = vmatpush3.bf16.msra.mxu1 %v3530_v51  ;;  %v2607_v60 = vld [vmem:[#allocation10 + $0x98] ss:$12 sps:$4 sm:$0xff]  }
 0x70a   :  { %1466 = vmatprep.subr.bf16.mxu0 %v3469_v52  ;;  %2364 = vmatprep.subr.bf16.mxu1 %v2904_v17  ;;  %v2608_v52 = vld [vmem:[#allocation10 + $0xb0] ss:$12 sps:$4 sm:$0xff]  }
 0x70b   :  { %1496 = vmatprep.mubr.bf16.mxu0 %v2903_v0  ;;  %2378 = vmatprep.mubr.msk.bf16.mxu1 %vm2905_vm1, %v2904_v17  ;;  %v2606_v0 = vld [vmem:[#allocation10 + $0x80] ss:$12 sps:$4 sm:$0xff]  }
 0x70d   :  { %1467 = vmatpush1.bf16.msra.mxu0 %v3476_v41  ;;  %2365 = vmatpush3.bf16.msra.mxu1 %v3539_v49  ;;  %v2489_v41 = vld [vmem:[#allocation14] sm:$0xff]   ;;  %v1350_v49 = vunpack.c.h.bf16 %v3298_v43 }
 0x70e   :  { %1468 = vmatprep.subr.bf16.mxu0 %v3480_v62  ;;  %2366 = vmatprep.subr.bf16.mxu1 %v2904_v17 }
 0x711   :  { %1469 = vmatpush1.bf16.msra.mxu0 %v3484_v15  ;;  %2367 = vmatpush3.bf16.msra.mxu1 %v3545_v38 }
 0x712   :  { %1470 = vmatprep.subr.bf16.mxu0 %v3488_v37  ;;  %2368 = vmatprep.subr.bf16.mxu1 %v2904_v17  ;;  %v1349_v37 = vunpack.c.l.bf16 %v3298_v43 }
 0x715   :  { %1471 = vmatpush1.bf16.msra.mxu0 %v3492_v5  ;;  %2369 = vmatpush3.bf16.msra.mxu1 %v3551_v59 }
 0x716   :  { %1472 = vmatprep.subr.bf16.mxu0 %v3554_v54  ;;  %2370 = vmatprep.subr.bf16.mxu1 %v2904_v17 }
 0x719   :  { %1473 = vmatpush1.bf16.msra.mxu0 %v3558_v39  ;;  %2371 = vmatpush3.bf16.msra.mxu1 %v3561_v34 }
 0x71a   :  { %1474 = vmatprep.subr.bf16.mxu0 %v3564_v22  ;;  %2372 = vmatprep.subr.bf16.mxu1 %v2904_v17 }
 0x71d   :  { %1475 = vmatpush1.bf16.msra.mxu0 %v3568_v35  ;;  %2373 = vmatpush3.bf16.msra.mxu1 %v2606_v0  ;;  %v1458_v0 = vld [vmem:[#allocation2 + $0x54] sm:$0xff] }
 0x71e   :  { %1476 = vmatprep.subr.bf16.mxu0 %v3572_v18  ;;  %2374 = vmatprep.subr.bf16.mxu1 %v2904_v17 }
 0x721   :  { %1477 = vmatpush1.bf16.msra.mxu0 %v3576_v19  ;;  %2375 = vmatpush3.bf16.msra.mxu1 %v2607_v60 }
 0x722   :  { %1478 = vmatprep.subr.bf16.mxu0 %v3580_v20  ;;  %2376 = vmatprep.subr.bf16.mxu1 %v2904_v17 }
 0x725   :  { %1479 = vmatpush1.bf16.msra.mxu0 %v3584_v21  ;;  %2377 = vmatpush3.bf16.msra.mxu1 %v2608_v52 }
 0x726   :  { %2382 = vmatprep.subr.bf16.mxu0 %v2489_v41  ;;  %2406 = vmatprep.subr.bf16.mxu1 %v2497_v12 }
 0x7db   :  { %v1387_v62 = vpop.f32.mrb[40].mxu0  ;;  %v1428_v15 = vpop.f32.mrb[32].mxu1 }
 0x7dc   :  { %v1388_v5 = vadd.f32 %v1387_v62, %v3303_v46  ;;  %v1389_v3 = vpop.f32.mrb[41].mxu0  ;;  %v2360_v51 = vpop.f32.mrb[33].mxu1  ;;  %v1429_v43 = vadd.f32 %v1428_v15, %v3315_v47 }
 0x7dd   :  { %v1390_v38 = vadd.f32 %v1389_v3, %v3307_v58  ;;  %v1391_v59 = vpop.f32.mrb[42].mxu0  ;;  %v1431_v17 = vpop.f32.mrb[34].mxu1 }
 0x7de   :  { %v1434_v54 = vadd.f32 %v1388_v5, %v1349_v37  ;;  %v1392_v39 = vpop.f32.mrb[43].mxu0  ;;  %v2361_v34 = vpop.f32.mrb[35].mxu1  ;;  %v1461_v17 = vunpack.c.h.bf16 %v1458_v0 }
 0x7df   :  { %v1441_v22 = vadd.f32 %v1390_v38, %v1350_v49 }
 0x7e0   :  { %v2049_v35 = vmul.f32 -1.442695, %v1434_v54 }
 0x7e1   :  { %v2050_v18 = vmul.f32 -1.442695, %v1441_v22 }
 0x7e2   :  { %2565 = vpow2.f32 %v2049_v35 }
 0x7e3   :  { %2567 = vpow2.f32 %v2050_v18 }
 0x7ec   :  { %v2566_v19 = vpop.eup %2565 }
 0x7ed   :  { %v1438_v20 = vadd.f32 1.0, %v2566_v19  ;;  %v2568_v21 = vpop.eup %2567 }
 0x7ee   :  { %v1445_v30 = vadd.f32 1.0, %v2568_v21  ;;  %v1462_v21 = vunpack.c.h.bf16 %v3635_v23 }
 0x7ef   :  { %2569 = vrcp.f32 %v1438_v20 }
 0x7f0   :  { %2571 = vrcp.f32 %v1445_v30 }
 0x7f9   :  { %v2570_v31 = vpop.eup %2569 }
 0x7fa   :  { %v1448_v25 = vmul.f32 %v2570_v31, %v1429_v43  ;;  %v2572_v27 = vpop.eup %2571 }
 0x7fb   :  { %v1451_v28 = vsub.f32 1.0, %v2572_v27  ;;  %v1453_v7 = vmul.f32 %v2572_v27, %v3597_v44 }
 0x7fc   :  { %v1449_v26 = vadd.f32 %v1448_v25, %v1351_v24 }
 0x7fe   :  { %2573 = vtanh.f32 %v1449_v26 }
 0x808   :  { %v2574_v29 = vpop.eup %2573 }
 0x809   :  { %v1452_v6 = vmul.f32 %v2574_v29, %v1451_v28 }
 0x80b   :  { %v3640_v32 = vadd.f32 %v1453_v7, %v1452_v6 }
 0x80d   :  { %v1463_v8 = vpack.c.bf16 %v3640_v32, %v3640_v32 }
 0x80f   :  { %1497 = vmatmul.mubr.bf16.vlgmr.msra.gmra.mrb[44].mxu0 %v1463_v8  ;;  %2379 = vmatmul.mubr.bf16.vlgmr.msra.gmra.mrb[36].mxu1 %v1463_v8 }
 0x810   :  { %2383 = vmatpush3.bf16.msra.mxu0 %v2489_v41  ;;  %2398 = vmatprep.mubr.bf16.mxu0 %v1576_v10  ;;  %v1460_v41 = vunpack.c.l.bf16 %v1458_v0 }
 0x811   :  { %2384 = vmatprep.subr.bf16.mxu0 %v2490_v14  ;;  %2407 = vmatpush3.bf16.msra.mxu1 %v2497_v12 }
 0x812   :  { %2408 = vmatprep.subr.bf16.mxu1 %v2498_v4 }
 0x814   :  { %2385 = vmatpush3.bf16.msra.mxu0 %v2490_v14 }
 0x815   :  { %2386 = vmatprep.subr.bf16.mxu0 %v2491_v11  ;;  %2409 = vmatpush3.bf16.msra.mxu1 %v2498_v4 }
 0x816   :  { %2410 = vmatprep.subr.bf16.mxu1 %v2499_v16 }
 0x818   :  { %2387 = vmatpush3.bf16.msra.mxu0 %v2491_v11 }
 0x819   :  { %2388 = vmatprep.subr.bf16.mxu0 %v2492_v13  ;;  %2411 = vmatpush3.bf16.msra.mxu1 %v2499_v16 }
 0x81a   :  { %2412 = vmatprep.subr.bf16.mxu1 %v2500_v33 }
 0x81c   :  { %2389 = vmatpush3.bf16.msra.mxu0 %v2492_v13 }
 0x81d   :  { %2390 = vmatprep.subr.bf16.mxu0 %v2493_v56  ;;  %2413 = vmatpush3.bf16.msra.mxu1 %v2500_v33  ;;  %v2062_v33 = vld [vmem:[#allocation19] ss:$0 sm:$0xff] }
 0x81e   :  { %2414 = vmatprep.subr.bf16.mxu1 %v2501_v40 }
 0x820   :  { %2391 = vmatpush3.bf16.msra.mxu0 %v2493_v56 }
 0x821   :  { %2392 = vmatprep.subr.bf16.mxu0 %v2494_v1  ;;  %2415 = vmatpush3.bf16.msra.mxu1 %v2501_v40 }
 0x822   :  { %2416 = vmatprep.subr.bf16.mxu1 %v2502_v36 }
 0x824   :  { %2393 = vmatpush3.bf16.msra.mxu0 %v2494_v1 }
 0x825   :  { %2394 = vmatprep.subr.bf16.mxu0 %v2495_v2  ;;  %2417 = vmatpush3.bf16.msra.mxu1 %v2502_v36  ;;  %v2071_v36 = vld [vmem:[#allocation20] ss:$0 sm:$0xff] }
 0x826   :  { %2418 = vmatprep.subr.bf16.mxu1 %v2503_v42 }
 0x828   :  { %2395 = vmatpush3.bf16.msra.mxu0 %v2495_v2 }
 0x829   :  { %2396 = vmatprep.subr.bf16.mxu0 %v2496_v48  ;;  %2419 = vmatpush3.bf16.msra.mxu1 %v2503_v42 }
 0x82a   :  { %2420 = vmatprep.subr.bf16.mxu1 %v2504_v61 }
 0x82c   :  { %2397 = vmatpush3.bf16.msra.mxu0 %v2496_v48 }
 0x82d   :  { %2421 = vmatpush3.bf16.msra.mxu1 %v2504_v61 }
 0x82f   :  { %2399 = vmatmul.mubr.bf16.vlgmr.msra.gmra.mrb[48].mxu0 %v1577_v53 }
 0x830   :  { %2402 = vmatprep.mubr.bf16.mxu0 %v1578_v9 }
 0x8e2   :  { %v1498_v60 = vpop.f32.mrb[44].mxu0  ;;  %v1539_v52 = vpop.f32.mrb[36].mxu1 }
 0x8e3   :  { %v1499_v62 = vadd.f32 %v1498_v60, %v3303_v46  ;;  %v1500_v15 = vpop.f32.mrb[45].mxu0  ;;  %v2380_v37 = vpop.f32.mrb[37].mxu1  ;;  %v1540_v19 = vadd.f32 %v1539_v52, %v3315_v47 }
 0x8e4   :  { %v1501_v5 = vadd.f32 %v1500_v15, %v3307_v58  ;;  %v1502_v3 = vpop.f32.mrb[46].mxu0  ;;  %v1542_v51 = vpop.f32.mrb[38].mxu1  ;;  %v3653_v58 = vld [vmem:[#allocation16] ss:$0 sm:$0xff] }
 0x8e5   :  { %v1545_v49 = vadd.f32 %v1499_v62, %v1460_v41  ;;  %v1503_v38 = vpop.f32.mrb[47].mxu0  ;;  %v2381_v59 = vpop.f32.mrb[39].mxu1 }
 0x8e6   :  { %v1552_v39 = vadd.f32 %v1501_v5, %v1461_v17 }
 0x8e7   :  { %v2051_v54 = vmul.f32 -1.442695, %v1545_v49 }
 0x8e8   :  { %v2052_v34 = vmul.f32 -1.442695, %v1552_v39 }
 0x8e9   :  { %2575 = vpow2.f32 %v2051_v54 }
 0x8ea   :  { %2577 = vpow2.f32 %v2052_v34 }
 0x8f3   :  { %v2576_v22 = vpop.eup %2575 }
 0x8f4   :  { %v1549_v35 = vadd.f32 1.0, %v2576_v22  ;;  %v2578_v18 = vpop.eup %2577 }
 0x8f5   :  { %v1556_v46 = vadd.f32 1.0, %v2578_v18 }
 0x8f6   :  { %2579 = vrcp.f32 %v1549_v35 }
 0x8f7   :  { %2581 = vrcp.f32 %v1556_v46 }
 0x900   :  { %v2580_v20 = vpop.eup %2579 }
 0x901   :  { %v1559_v30 = vmul.f32 %v2580_v20, %v1540_v19  ;;  %v2582_v1 = vpop.eup %2581 }
 0x902   :  { %v2400_v43 = vpop.f32.mrb[48].mxu0  ;;  %v1562_v48 = vsub.f32 1.0, %v2582_v1  ;;  %v1564_v12 = vmul.f32 %v2582_v1, %v3640_v32 }
 0x903   :  { %v1560_v31 = vadd.f32 %v1559_v30, %v1462_v21  ;;  %v1694_v24 = vadd.f32 %v2400_v43, %v3653_v58  ;;  %v1685_v25 = vpop.f32.mrb[49].mxu0 }
 0x904   :  { %v1686_v26 = vadd.f32 %v3653_v58, %v1685_v25  ;;  %v2401_v27 = vpop.f32.mrb[50].mxu0 }
 0x905   :  { %2583 = vtanh.f32 %v1560_v31  ;;  %v1726_v28 = vmul.f32 0.01, %v1694_v24  ;;  %v1697_v29 = vadd.f32 %v2401_v27, %v3653_v58  ;;  %v1688_v47 = vpop.f32.mrb[51].mxu0  ;;  %vm1718_vm2 = vcmp.ge.f32.partialorder %v1694_v24, 0.0 }
 0x906   :  { %v1724_v6 = vmul.f32 0.01, %v1686_v26  ;;  %v1689_v7 = vadd.f32 %v3653_v58, %v1688_v47  ;;  %vm1716_vm3 = vcmp.ge.f32.partialorder %v1686_v26, 0.0 }
 0x907   :  { %vm1719_vm4 = vcmp.ge.f32.partialorder %v1697_v29, 0.0  ;;  %v1727_v23 = vmul.f32 0.01, %v1697_v29  ;;  %v1734_v14 = vsel %vm1718_vm2, %v1694_v24, %v1726_v28 }
 0x908   :  { %vm1717_vm5 = vcmp.ge.f32.partialorder %v1689_v7, 0.0  ;;  %v1725_v8 = vmul.f32 0.01, %v1689_v7  ;;  %v1732_v13 = vsel %vm1716_vm3, %v1686_v26, %v1724_v6 }
 0x909   :  { %v1735_v10 = vsel %vm1719_vm4, %v1697_v29, %v1727_v23 }
 0x90a   :  { %v1741_v11 = vpack.c.bf16 %v1735_v10, %v1734_v14  ;;  %v1733_v56 = vsel %vm1717_vm5, %v1689_v7, %v1725_v8 }
 0x90b   :  { %v1740_v2 = vpack.c.bf16 %v1733_v56, %v1732_v13 }
 0x90d   :  { %2422 = vmatprep.mubr.bf16.mxu1 %v1740_v2 }
 0x90e   :  { %2423 = vmatmul.mubr.bf16.vlgmr.msra.gmra.mrb[40].mxu1 %v1741_v11 }
 0x90f   :  { %v2584_v53 = vpop.eup %2583 }
 0x910   :  { %v1563_v9 = vmul.f32 %v2584_v53, %v1562_v48 }
 0x912   :  { %v3661_v4 = vadd.f32 %v1564_v12, %v1563_v9 }
 0x914   :  { %v1579_v16 = vpack.c.bf16 %v3661_v4, %v3640_v32 }
 0x916   :  { %2403 = vmatmul.mubr.bf16.gmra.mrb[52].mxu0 %v1579_v16 }
 0x9e1   :  { %v2424_v40 = vpop.f32.mrb[40].mxu1 }
 0x9e2   :  { %v1858_v42 = vadd.f32 %v2424_v40, %v2062_v33  ;;  %v1849_v61 = vpop.f32.mrb[41].mxu1 }
 0x9e3   :  { %v1850_v0 = vadd.f32 %v2062_v33, %v1849_v61  ;;  %v2425_v60 = vpop.f32.mrb[42].mxu1 }
 0x9e4   :  { %v1861_v52 = vadd.f32 %v2425_v60, %v2062_v33  ;;  %v1852_v41 = vpop.f32.mrb[43].mxu1  ;;  %v1905_v62 = vmul.f32 %v2071_v36, %v1858_v42 }
 0x9e5   :  { %v1853_v15 = vadd.f32 %v2062_v33, %v1852_v41  ;;  %v1903_v37 = vmul.f32 %v2071_v36, %v1850_v0 }
 0x9e6   :  { %v2096_v5 = vpack.c.bf16 %v1861_v52, %v1858_v42  ;;  %1915 = vadd.xlane.f32.xlu1 %v1905_v62  ;;  %v1906_v51 = vmul.f32 %v2071_v36, %v1861_v52 }
 0x9e7   :  { %v2091_v3 = vpack.c.bf16 %v1853_v15, %v1850_v0  ;;  %1911 = vadd.xlane.f32.xlu0 %v1903_v37  ;;  %v1904_v38 = vmul.f32 %v2071_v36, %v1853_v15 }
 0x9e8   :  { %2108 = vst [vmem:[#allocation23 + $0x8] sm:$0xff] %v2096_v5  }
 0x9e9   :  { %2092 = vst [vmem:[#allocation23] sm:$0xff] %v2091_v3   ;;  %v2404_v49 = vpop.f32.mrb[52].mxu0 }
 0x9ea   :  { %1917 = vadd.xlane.f32.xlu1 %v1906_v51  ;;  %v1710_v59 = vadd.f32 %v2404_v49, %v3653_v58  ;;  %v1701_v17 = vpop.f32.mrb[53].mxu0 }
 0x9eb   :  { %1913 = vadd.xlane.f32.xlu0 %v1904_v38  ;;  %v1702_v54 = vadd.f32 %v3653_v58, %v1701_v17  ;;  %v2405_v39 = vpop.f32.mrb[54].mxu0 }
 0x9ec   :  { %v1730_v34 = vmul.f32 0.01, %v1710_v59  ;;  %v1713_v22 = vadd.f32 %v2405_v39, %v3653_v58  ;;  %v1704_v35 = vpop.f32.mrb[55].mxu0  ;;  %vm1722_vm6 = vcmp.ge.f32.partialorder %v1710_v59, 0.0 }
 0x9ed   :  { %v1728_v18 = vmul.f32 0.01, %v1702_v54  ;;  %v1705_v46 = vadd.f32 %v3653_v58, %v1704_v35  ;;  %vm1720_vm7 = vcmp.ge.f32.partialorder %v1702_v54, 0.0 }
 0x9ee   :  { %vm1723_vm8 = vcmp.ge.f32.partialorder %v1713_v22, 0.0  ;;  %v1731_v19 = vmul.f32 0.01, %v1713_v22  ;;  %v1738_v21 = vsel %vm1722_vm6, %v1710_v59, %v1730_v34 }
 0x9ef   :  { %vm1721_vm9 = vcmp.ge.f32.partialorder %v1705_v46, 0.0  ;;  %v1729_v20 = vmul.f32 0.01, %v1705_v46  ;;  %v1736_v43 = vsel %vm1720_vm7, %v1702_v54, %v1728_v18 }
 0x9f0   :  { %v1739_v30 = vsel %vm1723_vm8, %v1713_v22, %v1731_v19 }
 0x9f1   :  { %v1737_v31 = vsel %vm1721_vm9, %v1705_v46, %v1729_v20  ;;  %v1743_v24 = vpack.c.bf16 %v1739_v30, %v1738_v21 }
 0x9f2   :  { %v1742_v25 = vpack.c.bf16 %v1737_v31, %v1736_v43 }
 0x9f4   :  { %2426 = vmatprep.mubr.bf16.mxu1 %v1742_v25 }
 0x9f5   :  { %2427 = vmatmul.mubr.bf16.gmra.mrb[44].mxu1 %v1743_v24 }
 0xac8   :  { %v2428_v26 = vpop.f32.mrb[44].mxu1 }
 0xac9   :  { %v1865_v27 = vpop.f32.mrb[45].mxu1  ;;  %v1874_v47 = vadd.f32 %v2428_v26, %v2062_v33 }
 0xaca   :  { %v1866_v28 = vadd.f32 %v2062_v33, %v1865_v27  ;;  %v2429_v29 = vpop.f32.mrb[46].mxu1 }
 0xacb   :  { %v1877_v6 = vadd.f32 %v2429_v29, %v2062_v33  ;;  %v1868_v58 = vpop.f32.mrb[47].mxu1  ;;  %v1909_v11 = vmul.f32 %v2071_v36, %v1874_v47 }
 0xacc   :  { %v1869_v7 = vadd.f32 %v2062_v33, %v1868_v58  ;;  %v1907_v23 = vmul.f32 %v2071_v36, %v1866_v28 }
 0xacd   :  { %v2106_v8 = vpack.c.bf16 %v1877_v6, %v1874_v47  ;;  %v1910_v13 = vmul.f32 %v2071_v36, %v1877_v6 }
 0xace   :  { %v2101_v14 = vpack.c.bf16 %v1869_v7, %v1866_v28  ;;  %1919 = vadd.xlane.f32.xlu0 %v1907_v23  ;;  %v1908_v10 = vmul.f32 %v2071_v36, %v1869_v7 }
 0xacf   :  { %2110 = vst [vmem:[#allocation23 + $0x18] sm:$0xff] %v2106_v8  }
 0xad0   :  { %2109 = vst [vmem:[#allocation23 + $0x10] sm:$0xff] %v2101_v14   ;;  %1921 = vadd.xlane.f32.xlu1 %v1908_v10 }
 0xad2   :  { %1923 = vadd.xlane.f32.xlu0 %v1909_v11 }
 0xad4   :  { %1925 = vadd.xlane.f32.xlu1 %v1910_v13 }
 0xad5   :  { %2840 = shalt.err (!%p2837_p0)
}
 0xad6   :  { %s2841_s21 = scalar_lea.hbm %s3719_s12, 512 }
 0xad7   :  { %p2842_p1 = scmp.ne.s32.totalorder %s3719_s12, %s2841_s21  ;;  %p2845_p2 = scmp.lt.u32.totalorder %s2841_s21, %s3719_s12 }
 0xad9   :  { %p2847_p3 = pnand %p2845_p2, %p2842_p1 }
 0xadb   :  { %2850 = shalt.err (!%p2847_p3)
}
 0xadc   :  { %1967 = dma.vmem_to_hbm [thread:$0]  %s1962_s7, 512, %s3719_s12, [#allocation24], %s2895_s18, %s2895_s18, %s2896_s26   ;;  %v1912_v56 = vpop.xlane.xlu0 %1911  ;;  %v1916_v48 = vpop.xlane.xlu1 %1915 }
 0xadd   :  { %v1927_v53 = vmul.f32 %v1912_v56, %v3321_v50  ;;  %v1929_v12 = vmul.f32 %v1916_v48, %v3415_v63  ;;  %s2907_s26 = smov [#allocation22]  }
 0xade   :  { %s1952_s15 = sshll.u32 %s2907_s26, 4  ;;  %s1953_s15 = int_to_ptr.vmem [resolvable:$true] %s1952_s15 }
 0xadf   :  { %s2851_s30 = scalar_lea.vmem %s1953_s15, 128  ;;  %p2856_p5 = scmp.lt.s32.totalorder %s1953_s15, %s1953_s15 }
 0xae0   :  { %v1914_v1 = vpop.xlane.xlu0 %1913  ;;  %v1918_v16 = vpop.xlane.xlu1 %1917  ;;  %p2852_p4 = scmp.ne.s32.totalorder %s1953_s15, %s2851_s30  ;;  %p2857_p6 = scmp.lt.s32.totalorder %s2851_s30, %s2851_s30 }
 0xae1   :  { %v1928_v2 = vmul.f32 %v1914_v1, %v3367_v57  ;;  %v1930_v40 = vmul.f32 %v1918_v16, %v3461_v55  ;;  %v1943_v55 = vstv %s3717_s10 }
 0xae2   :  { %p2858_p7 = por %p2857_p6, %p2856_p5 }
 0xae3   :  { %v1935_v9 = vadd.f32 %v1928_v2, %v1927_v53 }
 0xae4   :  { %p2859_p8 = pnand %p2858_p7, %p2852_p4 }
 0xae5   :  { %v1936_v33 = vadd.f32 %v1935_v9, %v1929_v12 }
 0xae7   :  { %v1937_v42 = vadd.f32 %v1936_v33, %v1930_v40 }
 0xb5b   :  { %v1920_v36 = vpop.xlane.xlu0 %1919 }
 0xb5c   :  { %v1931_v61 = vmul.f32 %v1920_v36, %v3525_v45 }
 0xb5d   :  { %v1922_v0 = vpop.xlane.xlu1 %1921 }
 0xb5e   :  { %v1938_v60 = vadd.f32 %v1937_v42, %v1931_v61  ;;  %v1932_v52 = vmul.f32 %v1922_v0, %v3597_v44 }
 0xb5f   :  { %v1924_v41 = vpop.xlane.xlu0 %1923 }
 0xb60   :  { %v1939_v57 = vadd.f32 %v1938_v60, %v1932_v52  ;;  %v1933_v62 = vmul.f32 %v1924_v41, %v3640_v32 }
 0xb61   :  { %v1926_v50 = vpop.xlane.xlu1 %1925 }
 0xb62   :  { %v1940_v15 = vadd.f32 %v1939_v57, %v1933_v62  ;;  %v1934_v63 = vmul.f32 %v1926_v50, %v3661_v4 }
 0xb64   :  { %v1941_v37 = vadd.f32 %v1940_v15, %v1934_v63 }
 0xb66   :  { %v1944_v45 = vadd.f32 %v1943_v55, %v1941_v37 }
 0xb68   :  { %1945 = vst [vmem:[#allocation22] sm:$0xff] %v1944_v45 }
 0xb69   :  { %2862 = shalt.err (!%p2859_p8)
}
 0xb6a   :  { %s2863_s27 = scalar_lea.hbm %s3718_s11, 128 }
 0xb6b   :  { %p2864_p9 = scmp.ne.s32.totalorder %s3718_s11, %s2863_s27  ;;  %p2867_p10 = scmp.lt.u32.totalorder %s2863_s27, %s3718_s11 }
 0xb6d   :  { %p2869_p11 = pnand %p2867_p10, %p2864_p9 }
 0xb6f   :  { %2872 = shalt.err (!%p2869_p11)
}
 0xb70   :  { %1955 = dma.vmem_to_hbm [thread:$0]  %s1953_s15, 128, %s3718_s11, [#allocation7]  }
 0xb71   :  { %2885 = dma.done.wait [#allocation7], 128  }
 0xb72   :  { %2886 = vsyncadd [#allocation7], 4294967168 }
 0xb73   :  { %2887 = dma.done.wait [#allocation24], 512  }
 0xb74   :  { %2888 = vsyncadd [#allocation24], 4294966784 }
 0xb75   :  { %1974 = vsyncpa [#allocation6], 1 }
 0xb76   :  { %1975 = vsyncpa [#allocation9], 1 }
 0xb77   :  { %1976 = vsyncpa [#allocation12], 1 }
 0xb78   :  { %1977 = vsyncpa [#allocation15], 1 }
 0xb79   :  { %1978 = vsyncpa [#allocation18], 1 }
 0xb7a   :  { %1979 = vsyncpa [#allocation21], 1 }
 0xb7b   :  { %1980 = vsyncpa [#allocation7], 1 }
 0xb7c   :  { %1981 = vsyncpa [#allocation24], 1 }

</bundles_post_ra>
